<compile_context>
chip_gen: v6e
topology: v6e:2x2x1
jax: 0.10.0
libtpu: 0.0.40
codegen_flags: <defaults>
</compile_context>

<pallas_src>
import functools

import jax
import jax.numpy as jnp
import numpy as np
from jax.experimental import pallas as pl
from jax.experimental.pallas import tpu as pltpu


def lstm_predictor_kernel(
    x_ref,        # (B, T)    full input sequence, VMEM-resident
    wih1_ref,     # (1, 4H)   layer-1 input weight row (K=1 -> VPU broadcast)
    whh1_ref,     # (H, 4H)   layer-1 hidden weight
    b1_ref,       # (1, 4H)   b_ih1 + b_hh1
    w2_ref,       # (2H, 4H)  [W_ih2^T ; W_hh2^T] fused -> one MXU dot per step
    b2_ref,       # (1, 4H)   b_ih2 + b_hh2
    wlin_ref,     # (1, H)    linear head weight row (N=1 -> VPU mul + reduce)
    blin_ref,     # (1, 1)
    out_ref,      # (B, T + future)
    *, seq_len, total_len, n_hidden,
):
    B = x_ref.shape[0]
    H = n_hidden

    # Hoist all loop-invariant loads / broadcasts out of the recurrence
    # (JAX does not CSE broadcast_in_dim inside the loop body).
    x_all = x_ref[...]                                          # (B, T)
    wih1 = wih1_ref[...]                                        # (1, 4H)
    whh1 = whh1_ref[...]                                        # (H, 4H)
    w2 = w2_ref[...]                                            # (2H, 4H)
    wlin = wlin_ref[...]                                        # (1, H)
    blin = blin_ref[...]                                        # (1, 1)
    b1b = jnp.broadcast_to(b1_ref[...], (B, 4 * H))
    b2b = jnp.broadcast_to(b2_ref[...], (B, 4 * H))
    x_iota = jax.lax.broadcasted_iota(jnp.int32, (B, seq_len), 1)
    out_iota = jax.lax.broadcasted_iota(jnp.int32, (B, total_len), 1)

    def activations(gates):
        # Single EUP sigmoid pass over the whole (B, 4H) vreg; tanh only on
        # the g slice.  PyTorch LSTMCell gate order: (i, f, g, o).
        s = jax.nn.sigmoid(gates)
        i = s[:, 0 * H:1 * H]
        f = s[:, 1 * H:2 * H]
        o = s[:, 3 * H:4 * H]
        g = jnp.tanh(gates[:, 2 * H:3 * H])
        return i, f, g, o

    def step(t, carry):
        h1, c1, h2, c2, prev_out, out_acc = carry

        # Current input: real x column while t < seq_len, otherwise feed back
        # the previous prediction.  Masked lane-reduce (exact: single nonzero)
        # instead of a dynamic lane slice.
        x_col = jnp.sum(jnp.where(x_iota == t, x_all, 0.0),
                        axis=-1, keepdims=True)                 # (B, 1)
        x_t = jnp.where(t < seq_len, x_col, prev_out)           # (B, 1)

        # Layer 1: K=1 input matmul folded into a VPU broadcast multiply.
        gates1 = (x_t * wih1
                  + jnp.dot(h1, whh1, preferred_element_type=jnp.float32)
                  + b1b)
        i1, f1, g1, o1 = activations(gates1)
        c1n = f1 * c1 + i1 * g1
        h1n = o1 * jnp.tanh(c1n)

        # Layer 2: one fused (B, 2H) @ (2H, 4H) MXU pass.
        hcat = jnp.concatenate([h1n, h2], axis=-1)              # (B, 2H)
        gates2 = (jnp.dot(hcat, w2, preferred_element_type=jnp.float32)
                  + b2b)
        i2, f2, g2, o2 = activations(gates2)
        c2n = f2 * c2 + i2 * g2
        h2n = o2 * jnp.tanh(c2n)

        # Linear head (N=1): VPU multiply + lane reduction, no MXU round trip.
        out = jnp.sum(h2n * wlin, axis=-1, keepdims=True) + blin  # (B, 1)

        # Accumulate into the lane-dense output slab (stored once at the end).
        out_acc = jnp.where(out_iota == t, out, out_acc)
        return (h1n, c1n, h2n, c2n, out, out_acc)

    zeros_h = jnp.zeros((B, H), jnp.float32)
    init = (zeros_h, zeros_h, zeros_h, zeros_h,
            jnp.zeros((B, 1), jnp.float32),
            jnp.zeros((B, total_len), jnp.float32))
    final = jax.lax.fori_loop(0, total_len, step, init,
                              unroll=(total_len <= 32))
    out_ref[...] = final[5]


def lstm_predictor_forward(x, params, *, n_hidden, future=0):
    """Pallas equivalent of LSTMPredictor.forward(x, future)."""
    B, T = x.shape
    T_total = T + future
    H = n_hidden

    (wih1_T, whh1_T, b1, wih2_T, whh2_T, b2, wlin_T, blin) = params

    # Plain-JAX glue: fuse layer-2 weights for a single per-step MXU dot and
    # lay the head weight out as a row for the VPU reduction.
    w2 = jnp.concatenate([wih2_T, whh2_T], axis=0)     # (2H, 4H)
    wlin_row = wlin_T.T                                # (1, H)

    kernel = functools.partial(
        lstm_predictor_kernel, seq_len=T, total_len=T_total, n_hidden=H)

    vmem = pl.BlockSpec(memory_space=pltpu.MemorySpace.VMEM)
    return pl.pallas_call(
        kernel,
        out_shape=jax.ShapeDtypeStruct((B, T_total), jnp.float32),
        # No grid: single invocation; every operand is tiny and fully
        # VMEM-resident; the recurrence is an in-kernel fori_loop.
        in_specs=[vmem] * 8,
        out_specs=vmem,
    )(x, wih1_T, whh1_T, b1, w2, b2, wlin_row, blin)


def make_params(key, n_hidden):
    """Deterministic synthetic parameters matching nn.LSTMCell / nn.Linear shapes."""
    H = n_hidden
    ks = jax.random.split(key, 10)
    bound = 1.0 / np.sqrt(H)

    def u(k, shape):
        return jax.random.uniform(k, shape, jnp.float32, -bound, bound)

    # LSTMCell(1, H): W_ih (4H, 1), W_hh (4H, H), b_ih (4H,), b_hh (4H,)
    wih1 = u(ks[0], (4 * H, 1))
    whh1 = u(ks[1], (4 * H, H))
    b1 = u(ks[2], (4 * H,)) + u(ks[3], (4 * H,))
    # LSTMCell(H, H)
    wih2 = u(ks[4], (4 * H, H))
    whh2 = u(ks[5], (4 * H, H))
    b2 = u(ks[6], (4 * H,)) + u(ks[7], (4 * H,))
    # Linear(H, 1)
    wlin = u(ks[8], (1, H))
    blin = u(ks[9], (1,))

    # Pre-transpose / reshape for the kernel (glue in plain JAX).
    return (
        wih1.T,                    # (1, 4H)
        whh1.T,                    # (H, 4H)
        b1.reshape(1, 4 * H),
        wih2.T,                    # (H, 4H)
        whh2.T,                    # (H, 4H)
        b2.reshape(1, 4 * H),
        wlin.T,                    # (H, 1)
        blin.reshape(1, 1),
    )


def reference_forward(x, params, *, n_hidden, future=0):
    """Pure-JAX reference of LSTMPredictor.forward for verification."""
    (wih1_T, whh1_T, b1, wih2_T, whh2_T, b2, wlin_T, blin) = params
    B, T = x.shape
    H = n_hidden
    h1 = c1 = h2 = c2 = jnp.zeros((B, H), jnp.float32)

    def cell(inp, h, c, wihT, whhT, b):
        g = inp @ wihT + h @ whhT + b
        i = jax.nn.sigmoid(g[:, 0 * H:1 * H])
        f = jax.nn.sigmoid(g[:, 1 * H:2 * H])
        gg = jnp.tanh(g[:, 2 * H:3 * H])
        o = jax.nn.sigmoid(g[:, 3 * H:4 * H])
        c_new = f * c + i * gg
        return o * jnp.tanh(c_new), c_new

    outs = []
    out = jnp.zeros((B, 1), jnp.float32)
    for t in range(T):
        h1, c1 = cell(x[:, t:t + 1], h1, c1, wih1_T, whh1_T, b1)
        h2, c2 = cell(h1, h2, c2, wih2_T, whh2_T, b2)
        out = h2 @ wlin_T + blin
        outs.append(out)
    for _ in range(future):
        h1, c1 = cell(out, h1, c1, wih1_T, whh1_T, b1)
        h2, c2 = cell(h1, h2, c2, wih2_T, whh2_T, b2)
        out = h2 @ wlin_T + blin
        outs.append(out)
    return jnp.concatenate(outs, axis=1)


if __name__ == "__main__":
    # Module default n_hidden=51 is not lane-aligned; use H=32 for the test
    # shapes (4H = 128 lanes exactly).
    B, T, H = 2, 8, 32
    FUTURE = 2

    key = jax.random.PRNGKey(0)
    kx, kp = jax.random.split(key)
    x = jax.random.normal(kx, (B, T), jnp.float32)
    params = make_params(kp, H)

    out = lstm_predictor_forward(x, params, n_hidden=H, future=FUTURE)
    out = jax.block_until_ready(out)

    ref = reference_forward(x, params, n_hidden=H, future=FUTURE)
    assert out.shape == (B, T + FUTURE), out.shape
    np.testing.assert_allclose(np.asarray(out), np.asarray(ref),
                               rtol=2e-5, atol=2e-5)

    print("KERNEL_OK")
</pallas_src>

<mosaic_0001>
module attributes {stable_mosaic.version = 11 : i64} {
  func.func @lstm_predictor_kernel(%arg0: memref<2x8xf32, #tpu.memory_space<vmem>>, %arg1: memref<1x128xf32, #tpu.memory_space<vmem>>, %arg2: memref<32x128xf32, #tpu.memory_space<vmem>>, %arg3: memref<1x128xf32, #tpu.memory_space<vmem>>, %arg4: memref<64x128xf32, #tpu.memory_space<vmem>>, %arg5: memref<1x128xf32, #tpu.memory_space<vmem>>, %arg6: memref<1x32xf32, #tpu.memory_space<vmem>>, %arg7: memref<1x1xf32, #tpu.memory_space<vmem>>, %arg8: memref<2x10xf32, #tpu.memory_space<vmem>>) attributes {dimension_semantics = [], scalar_prefetch = 0 : i64, scratch_operands = 0 : i64, tpu.core_type = #tpu.core_type<tc>} {
    %c0 = arith.constant 0 : index
    %c0_0 = arith.constant 0 : index
    %0 = vector.load %arg0[%c0, %c0_0] : memref<2x8xf32, #tpu.memory_space<vmem>>, vector<2x8xf32>
    %c0_1 = arith.constant 0 : index
    %c0_2 = arith.constant 0 : index
    %1 = vector.load %arg1[%c0_1, %c0_2] : memref<1x128xf32, #tpu.memory_space<vmem>>, vector<1x128xf32>
    %c0_3 = arith.constant 0 : index
    %c0_4 = arith.constant 0 : index
    %2 = vector.load %arg2[%c0_3, %c0_4] : memref<32x128xf32, #tpu.memory_space<vmem>>, vector<32x128xf32>
    %c0_5 = arith.constant 0 : index
    %c0_6 = arith.constant 0 : index
    %3 = vector.load %arg4[%c0_5, %c0_6] : memref<64x128xf32, #tpu.memory_space<vmem>>, vector<64x128xf32>
    %c0_7 = arith.constant 0 : index
    %c0_8 = arith.constant 0 : index
    %4 = vector.load %arg6[%c0_7, %c0_8] : memref<1x32xf32, #tpu.memory_space<vmem>>, vector<1x32xf32>
    %c0_9 = arith.constant 0 : index
    %c0_10 = arith.constant 0 : index
    %5 = vector.load %arg7[%c0_9, %c0_10] : memref<1x1xf32, #tpu.memory_space<vmem>>, vector<1x1xf32>
    %c0_11 = arith.constant 0 : index
    %c0_12 = arith.constant 0 : index
    %6 = vector.load %arg3[%c0_11, %c0_12] : memref<1x128xf32, #tpu.memory_space<vmem>>, vector<1x128xf32>
    %7 = vector.shape_cast %6 : vector<1x128xf32> to vector<1x128xf32>
    %8 = vector.broadcast %7 : vector<1x128xf32> to vector<2x128xf32>
    %c0_13 = arith.constant 0 : index
    %c0_14 = arith.constant 0 : index
    %9 = vector.load %arg5[%c0_13, %c0_14] : memref<1x128xf32, #tpu.memory_space<vmem>>, vector<1x128xf32>
    %10 = vector.shape_cast %9 : vector<1x128xf32> to vector<1x128xf32>
    %11 = vector.broadcast %10 : vector<1x128xf32> to vector<2x128xf32>
    %12 = tpu.iota {dimensions = array<i32: 1>} : vector<2x8xi32>
    %13 = tpu.iota {dimensions = array<i32: 1>} : vector<2x10xi32>
    %cst = arith.constant 0.000000e+00 : f32
    %14 = vector.broadcast %cst : f32 to vector<2x32xf32>
    %cst_15 = arith.constant 0.000000e+00 : f32
    %15 = vector.broadcast %cst_15 : f32 to vector<2x1xf32>
    %cst_16 = arith.constant 0.000000e+00 : f32
    %16 = vector.broadcast %cst_16 : f32 to vector<2x10xf32>
    %c0_i32 = arith.constant 0 : i32
    %17 = vector.broadcast %c0_i32 : i32 to vector<2x8xi32>
    %18 = arith.cmpi eq, %12, %17 : vector<2x8xi32>
    %cst_17 = arith.constant 0.000000e+00 : f32
    %19 = vector.broadcast %cst_17 : f32 to vector<2x8xf32>
    %20 = arith.select %18, %0, %19 : vector<2x8xi1>, vector<2x8xf32>
    %cst_18 = arith.constant dense<0.000000e+00> : vector<2xf32>
    %21 = vector.multi_reduction <add>, %20, %cst_18 [1] : vector<2x8xf32> to vector<2xf32>
    %22 = vector.shape_cast %21 : vector<2xf32> to vector<2x1xf32>
    %c8_i32 = arith.constant 8 : i32
    %23 = arith.cmpi slt, %c0_i32, %c8_i32 : i32
    %24 = arith.select %23, %22, %15 : vector<2x1xf32>
    %25 = vector.broadcast %24 : vector<2x1xf32> to vector<2x128xf32>
    %26 = vector.broadcast %1 : vector<1x128xf32> to vector<2x128xf32>
    %27 = arith.mulf %25, %26 : vector<2x128xf32>
    %cst_19 = arith.constant dense<0.000000e+00> : vector<2x128xf32>
    %28 = tpu.matmul %14, %2, %cst_19 {dimension_numbers = #tpu.dot_dimension_numbers<[1], [0], [0], [1], [0, 0, 1, 1], [], []>} : vector<2x32xf32>, vector<32x128xf32>, vector<2x128xf32> -> vector<2x128xf32>
    %29 = arith.addf %27, %28 : vector<2x128xf32>
    %30 = arith.addf %29, %8 : vector<2x128xf32>
    %31 = arith.negf %30 : vector<2x128xf32>
    %32 = math.exp %31 : vector<2x128xf32>
    %cst_20 = arith.constant 1.000000e+00 : f32
    %33 = vector.broadcast %cst_20 : f32 to vector<2x128xf32>
    %34 = arith.addf %33, %32 : vector<2x128xf32>
    %35 = arith.divf %33, %34 : vector<2x128xf32>
    %36 = vector.extract_strided_slice %35 {offsets = [0, 0], sizes = [2, 32], strides = [1, 1]} : vector<2x128xf32> to vector<2x32xf32>
    %37 = vector.extract_strided_slice %35 {offsets = [0, 32], sizes = [2, 32], strides = [1, 1]} : vector<2x128xf32> to vector<2x32xf32>
    %38 = vector.extract_strided_slice %35 {offsets = [0, 96], sizes = [2, 32], strides = [1, 1]} : vector<2x128xf32> to vector<2x32xf32>
    %39 = vector.extract_strided_slice %30 {offsets = [0, 64], sizes = [2, 32], strides = [1, 1]} : vector<2x128xf32> to vector<2x32xf32>
    %40 = math.tanh %39 : vector<2x32xf32>
    %41 = arith.mulf %37, %14 : vector<2x32xf32>
    %42 = arith.mulf %36, %40 : vector<2x32xf32>
    %43 = arith.addf %41, %42 : vector<2x32xf32>
    %44 = math.tanh %43 : vector<2x32xf32>
    %45 = arith.mulf %38, %44 : vector<2x32xf32>
    %46 = tpu.concatenate %45, %14 in 1 : vector<2x32xf32>, vector<2x32xf32> -> vector<2x64xf32>
    %cst_21 = arith.constant dense<0.000000e+00> : vector<2x128xf32>
    %47 = tpu.matmul %46, %3, %cst_21 {dimension_numbers = #tpu.dot_dimension_numbers<[1], [0], [0], [1], [0, 0, 1, 1], [], []>} : vector<2x64xf32>, vector<64x128xf32>, vector<2x128xf32> -> vector<2x128xf32>
    %48 = arith.addf %47, %11 : vector<2x128xf32>
    %49 = arith.negf %48 : vector<2x128xf32>
    %50 = math.exp %49 : vector<2x128xf32>
    %cst_22 = arith.constant 1.000000e+00 : f32
    %51 = vector.broadcast %cst_22 : f32 to vector<2x128xf32>
    %52 = arith.addf %51, %50 : vector<2x128xf32>
    %53 = arith.divf %51, %52 : vector<2x128xf32>
    %54 = vector.extract_strided_slice %53 {offsets = [0, 0], sizes = [2, 32], strides = [1, 1]} : vector<2x128xf32> to vector<2x32xf32>
    %55 = vector.extract_strided_slice %53 {offsets = [0, 32], sizes = [2, 32], strides = [1, 1]} : vector<2x128xf32> to vector<2x32xf32>
    %56 = vector.extract_strided_slice %53 {offsets = [0, 96], sizes = [2, 32], strides = [1, 1]} : vector<2x128xf32> to vector<2x32xf32>
    %57 = vector.extract_strided_slice %48 {offsets = [0, 64], sizes = [2, 32], strides = [1, 1]} : vector<2x128xf32> to vector<2x32xf32>
    %58 = math.tanh %57 : vector<2x32xf32>
    %59 = arith.mulf %55, %14 : vector<2x32xf32>
    %60 = arith.mulf %54, %58 : vector<2x32xf32>
    %61 = arith.addf %59, %60 : vector<2x32xf32>
    %62 = math.tanh %61 : vector<2x32xf32>
    %63 = arith.mulf %56, %62 : vector<2x32xf32>
    %64 = vector.broadcast %4 : vector<1x32xf32> to vector<2x32xf32>
    %65 = arith.mulf %63, %64 : vector<2x32xf32>
    %cst_23 = arith.constant dense<0.000000e+00> : vector<2xf32>
    %66 = vector.multi_reduction <add>, %65, %cst_23 [1] : vector<2x32xf32> to vector<2xf32>
    %67 = vector.shape_cast %66 : vector<2xf32> to vector<2x1xf32>
    %68 = vector.broadcast %5 : vector<1x1xf32> to vector<2x1xf32>
    %69 = arith.addf %67, %68 : vector<2x1xf32>
    %70 = vector.broadcast %c0_i32 : i32 to vector<2x10xi32>
    %71 = arith.cmpi eq, %13, %70 : vector<2x10xi32>
    %72 = vector.shape_cast %69 : vector<2x1xf32> to vector<2x1xf32>
    %73 = vector.broadcast %72 : vector<2x1xf32> to vector<2x10xf32>
    %74 = arith.select %71, %73, %16 : vector<2x10xi1>, vector<2x10xf32>
    %c1_i32 = arith.constant 1 : i32
    %75 = vector.broadcast %c1_i32 : i32 to vector<2x8xi32>
    %76 = arith.cmpi eq, %12, %75 : vector<2x8xi32>
    %cst_24 = arith.constant 0.000000e+00 : f32
    %77 = vector.broadcast %cst_24 : f32 to vector<2x8xf32>
    %78 = arith.select %76, %0, %77 : vector<2x8xi1>, vector<2x8xf32>
    %cst_25 = arith.constant dense<0.000000e+00> : vector<2xf32>
    %79 = vector.multi_reduction <add>, %78, %cst_25 [1] : vector<2x8xf32> to vector<2xf32>
    %80 = vector.shape_cast %79 : vector<2xf32> to vector<2x1xf32>
    %c8_i32_26 = arith.constant 8 : i32
    %81 = arith.cmpi slt, %c1_i32, %c8_i32_26 : i32
    %82 = arith.select %81, %80, %69 : vector<2x1xf32>
    %83 = vector.broadcast %82 : vector<2x1xf32> to vector<2x128xf32>
    %84 = vector.broadcast %1 : vector<1x128xf32> to vector<2x128xf32>
    %85 = arith.mulf %83, %84 : vector<2x128xf32>
    %cst_27 = arith.constant dense<0.000000e+00> : vector<2x128xf32>
    %86 = tpu.matmul %45, %2, %cst_27 {dimension_numbers = #tpu.dot_dimension_numbers<[1], [0], [0], [1], [0, 0, 1, 1], [], []>} : vector<2x32xf32>, vector<32x128xf32>, vector<2x128xf32> -> vector<2x128xf32>
    %87 = arith.addf %85, %86 : vector<2x128xf32>
    %88 = arith.addf %87, %8 : vector<2x128xf32>
    %89 = arith.negf %88 : vector<2x128xf32>
    %90 = math.exp %89 : vector<2x128xf32>
    %cst_28 = arith.constant 1.000000e+00 : f32
    %91 = vector.broadcast %cst_28 : f32 to vector<2x128xf32>
    %92 = arith.addf %91, %90 : vector<2x128xf32>
    %93 = arith.divf %91, %92 : vector<2x128xf32>
    %94 = vector.extract_strided_slice %93 {offsets = [0, 0], sizes = [2, 32], strides = [1, 1]} : vector<2x128xf32> to vector<2x32xf32>
    %95 = vector.extract_strided_slice %93 {offsets = [0, 32], sizes = [2, 32], strides = [1, 1]} : vector<2x128xf32> to vector<2x32xf32>
    %96 = vector.extract_strided_slice %93 {offsets = [0, 96], sizes = [2, 32], strides = [1, 1]} : vector<2x128xf32> to vector<2x32xf32>
    %97 = vector.extract_strided_slice %88 {offsets = [0, 64], sizes = [2, 32], strides = [1, 1]} : vector<2x128xf32> to vector<2x32xf32>
    %98 = math.tanh %97 : vector<2x32xf32>
    %99 = arith.mulf %95, %43 : vector<2x32xf32>
    %100 = arith.mulf %94, %98 : vector<2x32xf32>
    %101 = arith.addf %99, %100 : vector<2x32xf32>
    %102 = math.tanh %101 : vector<2x32xf32>
    %103 = arith.mulf %96, %102 : vector<2x32xf32>
    %104 = tpu.concatenate %103, %63 in 1 : vector<2x32xf32>, vector<2x32xf32> -> vector<2x64xf32>
    %cst_29 = arith.constant dense<0.000000e+00> : vector<2x128xf32>
    %105 = tpu.matmul %104, %3, %cst_29 {dimension_numbers = #tpu.dot_dimension_numbers<[1], [0], [0], [1], [0, 0, 1, 1], [], []>} : vector<2x64xf32>, vector<64x128xf32>, vector<2x128xf32> -> vector<2x128xf32>
    %106 = arith.addf %105, %11 : vector<2x128xf32>
    %107 = arith.negf %106 : vector<2x128xf32>
    %108 = math.exp %107 : vector<2x128xf32>
    %cst_30 = arith.constant 1.000000e+00 : f32
    %109 = vector.broadcast %cst_30 : f32 to vector<2x128xf32>
    %110 = arith.addf %109, %108 : vector<2x128xf32>
    %111 = arith.divf %109, %110 : vector<2x128xf32>
    %112 = vector.extract_strided_slice %111 {offsets = [0, 0], sizes = [2, 32], strides = [1, 1]} : vector<2x128xf32> to vector<2x32xf32>
    %113 = vector.extract_strided_slice %111 {offsets = [0, 32], sizes = [2, 32], strides = [1, 1]} : vector<2x128xf32> to vector<2x32xf32>
    %114 = vector.extract_strided_slice %111 {offsets = [0, 96], sizes = [2, 32], strides = [1, 1]} : vector<2x128xf32> to vector<2x32xf32>
    %115 = vector.extract_strided_slice %106 {offsets = [0, 64], sizes = [2, 32], strides = [1, 1]} : vector<2x128xf32> to vector<2x32xf32>
    %116 = math.tanh %115 : vector<2x32xf32>
    %117 = arith.mulf %113, %61 : vector<2x32xf32>
    %118 = arith.mulf %112, %116 : vector<2x32xf32>
    %119 = arith.addf %117, %118 : vector<2x32xf32>
    %120 = math.tanh %119 : vector<2x32xf32>
    %121 = arith.mulf %114, %120 : vector<2x32xf32>
    %122 = vector.broadcast %4 : vector<1x32xf32> to vector<2x32xf32>
    %123 = arith.mulf %121, %122 : vector<2x32xf32>
    %cst_31 = arith.constant dense<0.000000e+00> : vector<2xf32>
    %124 = vector.multi_reduction <add>, %123, %cst_31 [1] : vector<2x32xf32> to vector<2xf32>
    %125 = vector.shape_cast %124 : vector<2xf32> to vector<2x1xf32>
    %126 = vector.broadcast %5 : vector<1x1xf32> to vector<2x1xf32>
    %127 = arith.addf %125, %126 : vector<2x1xf32>
    %128 = vector.broadcast %c1_i32 : i32 to vector<2x10xi32>
    %129 = arith.cmpi eq, %13, %128 : vector<2x10xi32>
    %130 = vector.shape_cast %127 : vector<2x1xf32> to vector<2x1xf32>
    %131 = vector.broadcast %130 : vector<2x1xf32> to vector<2x10xf32>
    %132 = arith.select %129, %131, %74 : vector<2x10xi1>, vector<2x10xf32>
    %c2_i32 = arith.constant 2 : i32
    %133 = vector.broadcast %c2_i32 : i32 to vector<2x8xi32>
    %134 = arith.cmpi eq, %12, %133 : vector<2x8xi32>
    %cst_32 = arith.constant 0.000000e+00 : f32
    %135 = vector.broadcast %cst_32 : f32 to vector<2x8xf32>
    %136 = arith.select %134, %0, %135 : vector<2x8xi1>, vector<2x8xf32>
    %cst_33 = arith.constant dense<0.000000e+00> : vector<2xf32>
    %137 = vector.multi_reduction <add>, %136, %cst_33 [1] : vector<2x8xf32> to vector<2xf32>
    %138 = vector.shape_cast %137 : vector<2xf32> to vector<2x1xf32>
    %c8_i32_34 = arith.constant 8 : i32
    %139 = arith.cmpi slt, %c2_i32, %c8_i32_34 : i32
    %140 = arith.select %139, %138, %127 : vector<2x1xf32>
    %141 = vector.broadcast %140 : vector<2x1xf32> to vector<2x128xf32>
    %142 = vector.broadcast %1 : vector<1x128xf32> to vector<2x128xf32>
    %143 = arith.mulf %141, %142 : vector<2x128xf32>
    %cst_35 = arith.constant dense<0.000000e+00> : vector<2x128xf32>
    %144 = tpu.matmul %103, %2, %cst_35 {dimension_numbers = #tpu.dot_dimension_numbers<[1], [0], [0], [1], [0, 0, 1, 1], [], []>} : vector<2x32xf32>, vector<32x128xf32>, vector<2x128xf32> -> vector<2x128xf32>
    %145 = arith.addf %143, %144 : vector<2x128xf32>
    %146 = arith.addf %145, %8 : vector<2x128xf32>
    %147 = arith.negf %146 : vector<2x128xf32>
    %148 = math.exp %147 : vector<2x128xf32>
    %cst_36 = arith.constant 1.000000e+00 : f32
    %149 = vector.broadcast %cst_36 : f32 to vector<2x128xf32>
    %150 = arith.addf %149, %148 : vector<2x128xf32>
    %151 = arith.divf %149, %150 : vector<2x128xf32>
    %152 = vector.extract_strided_slice %151 {offsets = [0, 0], sizes = [2, 32], strides = [1, 1]} : vector<2x128xf32> to vector<2x32xf32>
    %153 = vector.extract_strided_slice %151 {offsets = [0, 32], sizes = [2, 32], strides = [1, 1]} : vector<2x128xf32> to vector<2x32xf32>
    %154 = vector.extract_strided_slice %151 {offsets = [0, 96], sizes = [2, 32], strides = [1, 1]} : vector<2x128xf32> to vector<2x32xf32>
    %155 = vector.extract_strided_slice %146 {offsets = [0, 64], sizes = [2, 32], strides = [1, 1]} : vector<2x128xf32> to vector<2x32xf32>
    %156 = math.tanh %155 : vector<2x32xf32>
    %157 = arith.mulf %153, %101 : vector<2x32xf32>
    %158 = arith.mulf %152, %156 : vector<2x32xf32>
    %159 = arith.addf %157, %158 : vector<2x32xf32>
    %160 = math.tanh %159 : vector<2x32xf32>
    %161 = arith.mulf %154, %160 : vector<2x32xf32>
    %162 = tpu.concatenate %161, %121 in 1 : vector<2x32xf32>, vector<2x32xf32> -> vector<2x64xf32>
    %cst_37 = arith.constant dense<0.000000e+00> : vector<2x128xf32>
    %163 = tpu.matmul %162, %3, %cst_37 {dimension_numbers = #tpu.dot_dimension_numbers<[1], [0], [0], [1], [0, 0, 1, 1], [], []>} : vector<2x64xf32>, vector<64x128xf32>, vector<2x128xf32> -> vector<2x128xf32>
    %164 = arith.addf %163, %11 : vector<2x128xf32>
    %165 = arith.negf %164 : vector<2x128xf32>
    %166 = math.exp %165 : vector<2x128xf32>
    %cst_38 = arith.constant 1.000000e+00 : f32
    %167 = vector.broadcast %cst_38 : f32 to vector<2x128xf32>
    %168 = arith.addf %167, %166 : vector<2x128xf32>
    %169 = arith.divf %167, %168 : vector<2x128xf32>
    %170 = vector.extract_strided_slice %169 {offsets = [0, 0], sizes = [2, 32], strides = [1, 1]} : vector<2x128xf32> to vector<2x32xf32>
    %171 = vector.extract_strided_slice %169 {offsets = [0, 32], sizes = [2, 32], strides = [1, 1]} : vector<2x128xf32> to vector<2x32xf32>
    %172 = vector.extract_strided_slice %169 {offsets = [0, 96], sizes = [2, 32], strides = [1, 1]} : vector<2x128xf32> to vector<2x32xf32>
    %173 = vector.extract_strided_slice %164 {offsets = [0, 64], sizes = [2, 32], strides = [1, 1]} : vector<2x128xf32> to vector<2x32xf32>
    %174 = math.tanh %173 : vector<2x32xf32>
    %175 = arith.mulf %171, %119 : vector<2x32xf32>
    %176 = arith.mulf %170, %174 : vector<2x32xf32>
    %177 = arith.addf %175, %176 : vector<2x32xf32>
    %178 = math.tanh %177 : vector<2x32xf32>
    %179 = arith.mulf %172, %178 : vector<2x32xf32>
    %180 = vector.broadcast %4 : vector<1x32xf32> to vector<2x32xf32>
    %181 = arith.mulf %179, %180 : vector<2x32xf32>
    %cst_39 = arith.constant dense<0.000000e+00> : vector<2xf32>
    %182 = vector.multi_reduction <add>, %181, %cst_39 [1] : vector<2x32xf32> to vector<2xf32>
    %183 = vector.shape_cast %182 : vector<2xf32> to vector<2x1xf32>
    %184 = vector.broadcast %5 : vector<1x1xf32> to vector<2x1xf32>
    %185 = arith.addf %183, %184 : vector<2x1xf32>
    %186 = vector.broadcast %c2_i32 : i32 to vector<2x10xi32>
    %187 = arith.cmpi eq, %13, %186 : vector<2x10xi32>
    %188 = vector.shape_cast %185 : vector<2x1xf32> to vector<2x1xf32>
    %189 = vector.broadcast %188 : vector<2x1xf32> to vector<2x10xf32>
    %190 = arith.select %187, %189, %132 : vector<2x10xi1>, vector<2x10xf32>
    %c3_i32 = arith.constant 3 : i32
    %191 = vector.broadcast %c3_i32 : i32 to vector<2x8xi32>
    %192 = arith.cmpi eq, %12, %191 : vector<2x8xi32>
    %cst_40 = arith.constant 0.000000e+00 : f32
    %193 = vector.broadcast %cst_40 : f32 to vector<2x8xf32>
    %194 = arith.select %192, %0, %193 : vector<2x8xi1>, vector<2x8xf32>
    %cst_41 = arith.constant dense<0.000000e+00> : vector<2xf32>
    %195 = vector.multi_reduction <add>, %194, %cst_41 [1] : vector<2x8xf32> to vector<2xf32>
    %196 = vector.shape_cast %195 : vector<2xf32> to vector<2x1xf32>
    %c8_i32_42 = arith.constant 8 : i32
    %197 = arith.cmpi slt, %c3_i32, %c8_i32_42 : i32
    %198 = arith.select %197, %196, %185 : vector<2x1xf32>
    %199 = vector.broadcast %198 : vector<2x1xf32> to vector<2x128xf32>
    %200 = vector.broadcast %1 : vector<1x128xf32> to vector<2x128xf32>
    %201 = arith.mulf %199, %200 : vector<2x128xf32>
    %cst_43 = arith.constant dense<0.000000e+00> : vector<2x128xf32>
    %202 = tpu.matmul %161, %2, %cst_43 {dimension_numbers = #tpu.dot_dimension_numbers<[1], [0], [0], [1], [0, 0, 1, 1], [], []>} : vector<2x32xf32>, vector<32x128xf32>, vector<2x128xf32> -> vector<2x128xf32>
    %203 = arith.addf %201, %202 : vector<2x128xf32>
    %204 = arith.addf %203, %8 : vector<2x128xf32>
    %205 = arith.negf %204 : vector<2x128xf32>
    %206 = math.exp %205 : vector<2x128xf32>
    %cst_44 = arith.constant 1.000000e+00 : f32
    %207 = vector.broadcast %cst_44 : f32 to vector<2x128xf32>
    %208 = arith.addf %207, %206 : vector<2x128xf32>
    %209 = arith.divf %207, %208 : vector<2x128xf32>
    %210 = vector.extract_strided_slice %209 {offsets = [0, 0], sizes = [2, 32], strides = [1, 1]} : vector<2x128xf32> to vector<2x32xf32>
    %211 = vector.extract_strided_slice %209 {offsets = [0, 32], sizes = [2, 32], strides = [1, 1]} : vector<2x128xf32> to vector<2x32xf32>
    %212 = vector.extract_strided_slice %209 {offsets = [0, 96], sizes = [2, 32], strides = [1, 1]} : vector<2x128xf32> to vector<2x32xf32>
    %213 = vector.extract_strided_slice %204 {offsets = [0, 64], sizes = [2, 32], strides = [1, 1]} : vector<2x128xf32> to vector<2x32xf32>
    %214 = math.tanh %213 : vector<2x32xf32>
    %215 = arith.mulf %211, %159 : vector<2x32xf32>
    %216 = arith.mulf %210, %214 : vector<2x32xf32>
    %217 = arith.addf %215, %216 : vector<2x32xf32>
    %218 = math.tanh %217 : vector<2x32xf32>
    %219 = arith.mulf %212, %218 : vector<2x32xf32>
    %220 = tpu.concatenate %219, %179 in 1 : vector<2x32xf32>, vector<2x32xf32> -> vector<2x64xf32>
    %cst_45 = arith.constant dense<0.000000e+00> : vector<2x128xf32>
    %221 = tpu.matmul %220, %3, %cst_45 {dimension_numbers = #tpu.dot_dimension_numbers<[1], [0], [0], [1], [0, 0, 1, 1], [], []>} : vector<2x64xf32>, vector<64x128xf32>, vector<2x128xf32> -> vector<2x128xf32>
    %222 = arith.addf %221, %11 : vector<2x128xf32>
    %223 = arith.negf %222 : vector<2x128xf32>
    %224 = math.exp %223 : vector<2x128xf32>
    %cst_46 = arith.constant 1.000000e+00 : f32
    %225 = vector.broadcast %cst_46 : f32 to vector<2x128xf32>
    %226 = arith.addf %225, %224 : vector<2x128xf32>
    %227 = arith.divf %225, %226 : vector<2x128xf32>
    %228 = vector.extract_strided_slice %227 {offsets = [0, 0], sizes = [2, 32], strides = [1, 1]} : vector<2x128xf32> to vector<2x32xf32>
    %229 = vector.extract_strided_slice %227 {offsets = [0, 32], sizes = [2, 32], strides = [1, 1]} : vector<2x128xf32> to vector<2x32xf32>
    %230 = vector.extract_strided_slice %227 {offsets = [0, 96], sizes = [2, 32], strides = [1, 1]} : vector<2x128xf32> to vector<2x32xf32>
    %231 = vector.extract_strided_slice %222 {offsets = [0, 64], sizes = [2, 32], strides = [1, 1]} : vector<2x128xf32> to vector<2x32xf32>
    %232 = math.tanh %231 : vector<2x32xf32>
    %233 = arith.mulf %229, %177 : vector<2x32xf32>
    %234 = arith.mulf %228, %232 : vector<2x32xf32>
    %235 = arith.addf %233, %234 : vector<2x32xf32>
    %236 = math.tanh %235 : vector<2x32xf32>
    %237 = arith.mulf %230, %236 : vector<2x32xf32>
    %238 = vector.broadcast %4 : vector<1x32xf32> to vector<2x32xf32>
    %239 = arith.mulf %237, %238 : vector<2x32xf32>
    %cst_47 = arith.constant dense<0.000000e+00> : vector<2xf32>
    %240 = vector.multi_reduction <add>, %239, %cst_47 [1] : vector<2x32xf32> to vector<2xf32>
    %241 = vector.shape_cast %240 : vector<2xf32> to vector<2x1xf32>
    %242 = vector.broadcast %5 : vector<1x1xf32> to vector<2x1xf32>
    %243 = arith.addf %241, %242 : vector<2x1xf32>
    %244 = vector.broadcast %c3_i32 : i32 to vector<2x10xi32>
    %245 = arith.cmpi eq, %13, %244 : vector<2x10xi32>
    %246 = vector.shape_cast %243 : vector<2x1xf32> to vector<2x1xf32>
    %247 = vector.broadcast %246 : vector<2x1xf32> to vector<2x10xf32>
    %248 = arith.select %245, %247, %190 : vector<2x10xi1>, vector<2x10xf32>
    %c4_i32 = arith.constant 4 : i32
    %249 = vector.broadcast %c4_i32 : i32 to vector<2x8xi32>
    %250 = arith.cmpi eq, %12, %249 : vector<2x8xi32>
    %cst_48 = arith.constant 0.000000e+00 : f32
    %251 = vector.broadcast %cst_48 : f32 to vector<2x8xf32>
    %252 = arith.select %250, %0, %251 : vector<2x8xi1>, vector<2x8xf32>
    %cst_49 = arith.constant dense<0.000000e+00> : vector<2xf32>
    %253 = vector.multi_reduction <add>, %252, %cst_49 [1] : vector<2x8xf32> to vector<2xf32>
    %254 = vector.shape_cast %253 : vector<2xf32> to vector<2x1xf32>
    %c8_i32_50 = arith.constant 8 : i32
    %255 = arith.cmpi slt, %c4_i32, %c8_i32_50 : i32
    %256 = arith.select %255, %254, %243 : vector<2x1xf32>
    %257 = vector.broadcast %256 : vector<2x1xf32> to vector<2x128xf32>
    %258 = vector.broadcast %1 : vector<1x128xf32> to vector<2x128xf32>
    %259 = arith.mulf %257, %258 : vector<2x128xf32>
    %cst_51 = arith.constant dense<0.000000e+00> : vector<2x128xf32>
    %260 = tpu.matmul %219, %2, %cst_51 {dimension_numbers = #tpu.dot_dimension_numbers<[1], [0], [0], [1], [0, 0, 1, 1], [], []>} : vector<2x32xf32>, vector<32x128xf32>, vector<2x128xf32> -> vector<2x128xf32>
    %261 = arith.addf %259, %260 : vector<2x128xf32>
    %262 = arith.addf %261, %8 : vector<2x128xf32>
    %263 = arith.negf %262 : vector<2x128xf32>
    %264 = math.exp %263 : vector<2x128xf32>
    %cst_52 = arith.constant 1.000000e+00 : f32
    %265 = vector.broadcast %cst_52 : f32 to vector<2x128xf32>
    %266 = arith.addf %265, %264 : vector<2x128xf32>
    %267 = arith.divf %265, %266 : vector<2x128xf32>
    %268 = vector.extract_strided_slice %267 {offsets = [0, 0], sizes = [2, 32], strides = [1, 1]} : vector<2x128xf32> to vector<2x32xf32>
    %269 = vector.extract_strided_slice %267 {offsets = [0, 32], sizes = [2, 32], strides = [1, 1]} : vector<2x128xf32> to vector<2x32xf32>
    %270 = vector.extract_strided_slice %267 {offsets = [0, 96], sizes = [2, 32], strides = [1, 1]} : vector<2x128xf32> to vector<2x32xf32>
    %271 = vector.extract_strided_slice %262 {offsets = [0, 64], sizes = [2, 32], strides = [1, 1]} : vector<2x128xf32> to vector<2x32xf32>
    %272 = math.tanh %271 : vector<2x32xf32>
    %273 = arith.mulf %269, %217 : vector<2x32xf32>
    %274 = arith.mulf %268, %272 : vector<2x32xf32>
    %275 = arith.addf %273, %274 : vector<2x32xf32>
    %276 = math.tanh %275 : vector<2x32xf32>
    %277 = arith.mulf %270, %276 : vector<2x32xf32>
    %278 = tpu.concatenate %277, %237 in 1 : vector<2x32xf32>, vector<2x32xf32> -> vector<2x64xf32>
    %cst_53 = arith.constant dense<0.000000e+00> : vector<2x128xf32>
    %279 = tpu.matmul %278, %3, %cst_53 {dimension_numbers = #tpu.dot_dimension_numbers<[1], [0], [0], [1], [0, 0, 1, 1], [], []>} : vector<2x64xf32>, vector<64x128xf32>, vector<2x128xf32> -> vector<2x128xf32>
    %280 = arith.addf %279, %11 : vector<2x128xf32>
    %281 = arith.negf %280 : vector<2x128xf32>
    %282 = math.exp %281 : vector<2x128xf32>
    %cst_54 = arith.constant 1.000000e+00 : f32
    %283 = vector.broadcast %cst_54 : f32 to vector<2x128xf32>
    %284 = arith.addf %283, %282 : vector<2x128xf32>
    %285 = arith.divf %283, %284 : vector<2x128xf32>
    %286 = vector.extract_strided_slice %285 {offsets = [0, 0], sizes = [2, 32], strides = [1, 1]} : vector<2x128xf32> to vector<2x32xf32>
    %287 = vector.extract_strided_slice %285 {offsets = [0, 32], sizes = [2, 32], strides = [1, 1]} : vector<2x128xf32> to vector<2x32xf32>
    %288 = vector.extract_strided_slice %285 {offsets = [0, 96], sizes = [2, 32], strides = [1, 1]} : vector<2x128xf32> to vector<2x32xf32>
    %289 = vector.extract_strided_slice %280 {offsets = [0, 64], sizes = [2, 32], strides = [1, 1]} : vector<2x128xf32> to vector<2x32xf32>
    %290 = math.tanh %289 : vector<2x32xf32>
    %291 = arith.mulf %287, %235 : vector<2x32xf32>
    %292 = arith.mulf %286, %290 : vector<2x32xf32>
    %293 = arith.addf %291, %292 : vector<2x32xf32>
    %294 = math.tanh %293 : vector<2x32xf32>
    %295 = arith.mulf %288, %294 : vector<2x32xf32>
    %296 = vector.broadcast %4 : vector<1x32xf32> to vector<2x32xf32>
    %297 = arith.mulf %295, %296 : vector<2x32xf32>
    %cst_55 = arith.constant dense<0.000000e+00> : vector<2xf32>
    %298 = vector.multi_reduction <add>, %297, %cst_55 [1] : vector<2x32xf32> to vector<2xf32>
    %299 = vector.shape_cast %298 : vector<2xf32> to vector<2x1xf32>
    %300 = vector.broadcast %5 : vector<1x1xf32> to vector<2x1xf32>
    %301 = arith.addf %299, %300 : vector<2x1xf32>
    %302 = vector.broadcast %c4_i32 : i32 to vector<2x10xi32>
    %303 = arith.cmpi eq, %13, %302 : vector<2x10xi32>
    %304 = vector.shape_cast %301 : vector<2x1xf32> to vector<2x1xf32>
    %305 = vector.broadcast %304 : vector<2x1xf32> to vector<2x10xf32>
    %306 = arith.select %303, %305, %248 : vector<2x10xi1>, vector<2x10xf32>
    %c5_i32 = arith.constant 5 : i32
    %307 = vector.broadcast %c5_i32 : i32 to vector<2x8xi32>
    %308 = arith.cmpi eq, %12, %307 : vector<2x8xi32>
    %cst_56 = arith.constant 0.000000e+00 : f32
    %309 = vector.broadcast %cst_56 : f32 to vector<2x8xf32>
    %310 = arith.select %308, %0, %309 : vector<2x8xi1>, vector<2x8xf32>
    %cst_57 = arith.constant dense<0.000000e+00> : vector<2xf32>
    %311 = vector.multi_reduction <add>, %310, %cst_57 [1] : vector<2x8xf32> to vector<2xf32>
    %312 = vector.shape_cast %311 : vector<2xf32> to vector<2x1xf32>
    %c8_i32_58 = arith.constant 8 : i32
    %313 = arith.cmpi slt, %c5_i32, %c8_i32_58 : i32
    %314 = arith.select %313, %312, %301 : vector<2x1xf32>
    %315 = vector.broadcast %314 : vector<2x1xf32> to vector<2x128xf32>
    %316 = vector.broadcast %1 : vector<1x128xf32> to vector<2x128xf32>
    %317 = arith.mulf %315, %316 : vector<2x128xf32>
    %cst_59 = arith.constant dense<0.000000e+00> : vector<2x128xf32>
    %318 = tpu.matmul %277, %2, %cst_59 {dimension_numbers = #tpu.dot_dimension_numbers<[1], [0], [0], [1], [0, 0, 1, 1], [], []>} : vector<2x32xf32>, vector<32x128xf32>, vector<2x128xf32> -> vector<2x128xf32>
    %319 = arith.addf %317, %318 : vector<2x128xf32>
    %320 = arith.addf %319, %8 : vector<2x128xf32>
    %321 = arith.negf %320 : vector<2x128xf32>
    %322 = math.exp %321 : vector<2x128xf32>
    %cst_60 = arith.constant 1.000000e+00 : f32
    %323 = vector.broadcast %cst_60 : f32 to vector<2x128xf32>
    %324 = arith.addf %323, %322 : vector<2x128xf32>
    %325 = arith.divf %323, %324 : vector<2x128xf32>
    %326 = vector.extract_strided_slice %325 {offsets = [0, 0], sizes = [2, 32], strides = [1, 1]} : vector<2x128xf32> to vector<2x32xf32>
    %327 = vector.extract_strided_slice %325 {offsets = [0, 32], sizes = [2, 32], strides = [1, 1]} : vector<2x128xf32> to vector<2x32xf32>
    %328 = vector.extract_strided_slice %325 {offsets = [0, 96], sizes = [2, 32], strides = [1, 1]} : vector<2x128xf32> to vector<2x32xf32>
    %329 = vector.extract_strided_slice %320 {offsets = [0, 64], sizes = [2, 32], strides = [1, 1]} : vector<2x128xf32> to vector<2x32xf32>
    %330 = math.tanh %329 : vector<2x32xf32>
    %331 = arith.mulf %327, %275 : vector<2x32xf32>
    %332 = arith.mulf %326, %330 : vector<2x32xf32>
    %333 = arith.addf %331, %332 : vector<2x32xf32>
    %334 = math.tanh %333 : vector<2x32xf32>
    %335 = arith.mulf %328, %334 : vector<2x32xf32>
    %336 = tpu.concatenate %335, %295 in 1 : vector<2x32xf32>, vector<2x32xf32> -> vector<2x64xf32>
    %cst_61 = arith.constant dense<0.000000e+00> : vector<2x128xf32>
    %337 = tpu.matmul %336, %3, %cst_61 {dimension_numbers = #tpu.dot_dimension_numbers<[1], [0], [0], [1], [0, 0, 1, 1], [], []>} : vector<2x64xf32>, vector<64x128xf32>, vector<2x128xf32> -> vector<2x128xf32>
    %338 = arith.addf %337, %11 : vector<2x128xf32>
    %339 = arith.negf %338 : vector<2x128xf32>
    %340 = math.exp %339 : vector<2x128xf32>
    %cst_62 = arith.constant 1.000000e+00 : f32
    %341 = vector.broadcast %cst_62 : f32 to vector<2x128xf32>
    %342 = arith.addf %341, %340 : vector<2x128xf32>
    %343 = arith.divf %341, %342 : vector<2x128xf32>
    %344 = vector.extract_strided_slice %343 {offsets = [0, 0], sizes = [2, 32], strides = [1, 1]} : vector<2x128xf32> to vector<2x32xf32>
    %345 = vector.extract_strided_slice %343 {offsets = [0, 32], sizes = [2, 32], strides = [1, 1]} : vector<2x128xf32> to vector<2x32xf32>
    %346 = vector.extract_strided_slice %343 {offsets = [0, 96], sizes = [2, 32], strides = [1, 1]} : vector<2x128xf32> to vector<2x32xf32>
    %347 = vector.extract_strided_slice %338 {offsets = [0, 64], sizes = [2, 32], strides = [1, 1]} : vector<2x128xf32> to vector<2x32xf32>
    %348 = math.tanh %347 : vector<2x32xf32>
    %349 = arith.mulf %345, %293 : vector<2x32xf32>
    %350 = arith.mulf %344, %348 : vector<2x32xf32>
    %351 = arith.addf %349, %350 : vector<2x32xf32>
    %352 = math.tanh %351 : vector<2x32xf32>
    %353 = arith.mulf %346, %352 : vector<2x32xf32>
    %354 = vector.broadcast %4 : vector<1x32xf32> to vector<2x32xf32>
    %355 = arith.mulf %353, %354 : vector<2x32xf32>
    %cst_63 = arith.constant dense<0.000000e+00> : vector<2xf32>
    %356 = vector.multi_reduction <add>, %355, %cst_63 [1] : vector<2x32xf32> to vector<2xf32>
    %357 = vector.shape_cast %356 : vector<2xf32> to vector<2x1xf32>
    %358 = vector.broadcast %5 : vector<1x1xf32> to vector<2x1xf32>
    %359 = arith.addf %357, %358 : vector<2x1xf32>
    %360 = vector.broadcast %c5_i32 : i32 to vector<2x10xi32>
    %361 = arith.cmpi eq, %13, %360 : vector<2x10xi32>
    %362 = vector.shape_cast %359 : vector<2x1xf32> to vector<2x1xf32>
    %363 = vector.broadcast %362 : vector<2x1xf32> to vector<2x10xf32>
    %364 = arith.select %361, %363, %306 : vector<2x10xi1>, vector<2x10xf32>
    %c6_i32 = arith.constant 6 : i32
    %365 = vector.broadcast %c6_i32 : i32 to vector<2x8xi32>
    %366 = arith.cmpi eq, %12, %365 : vector<2x8xi32>
    %cst_64 = arith.constant 0.000000e+00 : f32
    %367 = vector.broadcast %cst_64 : f32 to vector<2x8xf32>
    %368 = arith.select %366, %0, %367 : vector<2x8xi1>, vector<2x8xf32>
    %cst_65 = arith.constant dense<0.000000e+00> : vector<2xf32>
    %369 = vector.multi_reduction <add>, %368, %cst_65 [1] : vector<2x8xf32> to vector<2xf32>
    %370 = vector.shape_cast %369 : vector<2xf32> to vector<2x1xf32>
    %c8_i32_66 = arith.constant 8 : i32
    %371 = arith.cmpi slt, %c6_i32, %c8_i32_66 : i32
    %372 = arith.select %371, %370, %359 : vector<2x1xf32>
    %373 = vector.broadcast %372 : vector<2x1xf32> to vector<2x128xf32>
    %374 = vector.broadcast %1 : vector<1x128xf32> to vector<2x128xf32>
    %375 = arith.mulf %373, %374 : vector<2x128xf32>
    %cst_67 = arith.constant dense<0.000000e+00> : vector<2x128xf32>
    %376 = tpu.matmul %335, %2, %cst_67 {dimension_numbers = #tpu.dot_dimension_numbers<[1], [0], [0], [1], [0, 0, 1, 1], [], []>} : vector<2x32xf32>, vector<32x128xf32>, vector<2x128xf32> -> vector<2x128xf32>
    %377 = arith.addf %375, %376 : vector<2x128xf32>
    %378 = arith.addf %377, %8 : vector<2x128xf32>
    %379 = arith.negf %378 : vector<2x128xf32>
    %380 = math.exp %379 : vector<2x128xf32>
    %cst_68 = arith.constant 1.000000e+00 : f32
    %381 = vector.broadcast %cst_68 : f32 to vector<2x128xf32>
    %382 = arith.addf %381, %380 : vector<2x128xf32>
    %383 = arith.divf %381, %382 : vector<2x128xf32>
    %384 = vector.extract_strided_slice %383 {offsets = [0, 0], sizes = [2, 32], strides = [1, 1]} : vector<2x128xf32> to vector<2x32xf32>
    %385 = vector.extract_strided_slice %383 {offsets = [0, 32], sizes = [2, 32], strides = [1, 1]} : vector<2x128xf32> to vector<2x32xf32>
    %386 = vector.extract_strided_slice %383 {offsets = [0, 96], sizes = [2, 32], strides = [1, 1]} : vector<2x128xf32> to vector<2x32xf32>
    %387 = vector.extract_strided_slice %378 {offsets = [0, 64], sizes = [2, 32], strides = [1, 1]} : vector<2x128xf32> to vector<2x32xf32>
    %388 = math.tanh %387 : vector<2x32xf32>
    %389 = arith.mulf %385, %333 : vector<2x32xf32>
    %390 = arith.mulf %384, %388 : vector<2x32xf32>
    %391 = arith.addf %389, %390 : vector<2x32xf32>
    %392 = math.tanh %391 : vector<2x32xf32>
    %393 = arith.mulf %386, %392 : vector<2x32xf32>
    %394 = tpu.concatenate %393, %353 in 1 : vector<2x32xf32>, vector<2x32xf32> -> vector<2x64xf32>
    %cst_69 = arith.constant dense<0.000000e+00> : vector<2x128xf32>
    %395 = tpu.matmul %394, %3, %cst_69 {dimension_numbers = #tpu.dot_dimension_numbers<[1], [0], [0], [1], [0, 0, 1, 1], [], []>} : vector<2x64xf32>, vector<64x128xf32>, vector<2x128xf32> -> vector<2x128xf32>
    %396 = arith.addf %395, %11 : vector<2x128xf32>
    %397 = arith.negf %396 : vector<2x128xf32>
    %398 = math.exp %397 : vector<2x128xf32>
    %cst_70 = arith.constant 1.000000e+00 : f32
    %399 = vector.broadcast %cst_70 : f32 to vector<2x128xf32>
    %400 = arith.addf %399, %398 : vector<2x128xf32>
    %401 = arith.divf %399, %400 : vector<2x128xf32>
    %402 = vector.extract_strided_slice %401 {offsets = [0, 0], sizes = [2, 32], strides = [1, 1]} : vector<2x128xf32> to vector<2x32xf32>
    %403 = vector.extract_strided_slice %401 {offsets = [0, 32], sizes = [2, 32], strides = [1, 1]} : vector<2x128xf32> to vector<2x32xf32>
    %404 = vector.extract_strided_slice %401 {offsets = [0, 96], sizes = [2, 32], strides = [1, 1]} : vector<2x128xf32> to vector<2x32xf32>
    %405 = vector.extract_strided_slice %396 {offsets = [0, 64], sizes = [2, 32], strides = [1, 1]} : vector<2x128xf32> to vector<2x32xf32>
    %406 = math.tanh %405 : vector<2x32xf32>
    %407 = arith.mulf %403, %351 : vector<2x32xf32>
    %408 = arith.mulf %402, %406 : vector<2x32xf32>
    %409 = arith.addf %407, %408 : vector<2x32xf32>
    %410 = math.tanh %409 : vector<2x32xf32>
    %411 = arith.mulf %404, %410 : vector<2x32xf32>
    %412 = vector.broadcast %4 : vector<1x32xf32> to vector<2x32xf32>
    %413 = arith.mulf %411, %412 : vector<2x32xf32>
    %cst_71 = arith.constant dense<0.000000e+00> : vector<2xf32>
    %414 = vector.multi_reduction <add>, %413, %cst_71 [1] : vector<2x32xf32> to vector<2xf32>
    %415 = vector.shape_cast %414 : vector<2xf32> to vector<2x1xf32>
    %416 = vector.broadcast %5 : vector<1x1xf32> to vector<2x1xf32>
    %417 = arith.addf %415, %416 : vector<2x1xf32>
    %418 = vector.broadcast %c6_i32 : i32 to vector<2x10xi32>
    %419 = arith.cmpi eq, %13, %418 : vector<2x10xi32>
    %420 = vector.shape_cast %417 : vector<2x1xf32> to vector<2x1xf32>
    %421 = vector.broadcast %420 : vector<2x1xf32> to vector<2x10xf32>
    %422 = arith.select %419, %421, %364 : vector<2x10xi1>, vector<2x10xf32>
    %c7_i32 = arith.constant 7 : i32
    %423 = vector.broadcast %c7_i32 : i32 to vector<2x8xi32>
    %424 = arith.cmpi eq, %12, %423 : vector<2x8xi32>
    %cst_72 = arith.constant 0.000000e+00 : f32
    %425 = vector.broadcast %cst_72 : f32 to vector<2x8xf32>
    %426 = arith.select %424, %0, %425 : vector<2x8xi1>, vector<2x8xf32>
    %cst_73 = arith.constant dense<0.000000e+00> : vector<2xf32>
    %427 = vector.multi_reduction <add>, %426, %cst_73 [1] : vector<2x8xf32> to vector<2xf32>
    %428 = vector.shape_cast %427 : vector<2xf32> to vector<2x1xf32>
    %c8_i32_74 = arith.constant 8 : i32
    %429 = arith.cmpi slt, %c7_i32, %c8_i32_74 : i32
    %430 = arith.select %429, %428, %417 : vector<2x1xf32>
    %431 = vector.broadcast %430 : vector<2x1xf32> to vector<2x128xf32>
    %432 = vector.broadcast %1 : vector<1x128xf32> to vector<2x128xf32>
    %433 = arith.mulf %431, %432 : vector<2x128xf32>
    %cst_75 = arith.constant dense<0.000000e+00> : vector<2x128xf32>
    %434 = tpu.matmul %393, %2, %cst_75 {dimension_numbers = #tpu.dot_dimension_numbers<[1], [0], [0], [1], [0, 0, 1, 1], [], []>} : vector<2x32xf32>, vector<32x128xf32>, vector<2x128xf32> -> vector<2x128xf32>
    %435 = arith.addf %433, %434 : vector<2x128xf32>
    %436 = arith.addf %435, %8 : vector<2x128xf32>
    %437 = arith.negf %436 : vector<2x128xf32>
    %438 = math.exp %437 : vector<2x128xf32>
    %cst_76 = arith.constant 1.000000e+00 : f32
    %439 = vector.broadcast %cst_76 : f32 to vector<2x128xf32>
    %440 = arith.addf %439, %438 : vector<2x128xf32>
    %441 = arith.divf %439, %440 : vector<2x128xf32>
    %442 = vector.extract_strided_slice %441 {offsets = [0, 0], sizes = [2, 32], strides = [1, 1]} : vector<2x128xf32> to vector<2x32xf32>
    %443 = vector.extract_strided_slice %441 {offsets = [0, 32], sizes = [2, 32], strides = [1, 1]} : vector<2x128xf32> to vector<2x32xf32>
    %444 = vector.extract_strided_slice %441 {offsets = [0, 96], sizes = [2, 32], strides = [1, 1]} : vector<2x128xf32> to vector<2x32xf32>
    %445 = vector.extract_strided_slice %436 {offsets = [0, 64], sizes = [2, 32], strides = [1, 1]} : vector<2x128xf32> to vector<2x32xf32>
    %446 = math.tanh %445 : vector<2x32xf32>
    %447 = arith.mulf %443, %391 : vector<2x32xf32>
    %448 = arith.mulf %442, %446 : vector<2x32xf32>
    %449 = arith.addf %447, %448 : vector<2x32xf32>
    %450 = math.tanh %449 : vector<2x32xf32>
    %451 = arith.mulf %444, %450 : vector<2x32xf32>
    %452 = tpu.concatenate %451, %411 in 1 : vector<2x32xf32>, vector<2x32xf32> -> vector<2x64xf32>
    %cst_77 = arith.constant dense<0.000000e+00> : vector<2x128xf32>
    %453 = tpu.matmul %452, %3, %cst_77 {dimension_numbers = #tpu.dot_dimension_numbers<[1], [0], [0], [1], [0, 0, 1, 1], [], []>} : vector<2x64xf32>, vector<64x128xf32>, vector<2x128xf32> -> vector<2x128xf32>
    %454 = arith.addf %453, %11 : vector<2x128xf32>
    %455 = arith.negf %454 : vector<2x128xf32>
    %456 = math.exp %455 : vector<2x128xf32>
    %cst_78 = arith.constant 1.000000e+00 : f32
    %457 = vector.broadcast %cst_78 : f32 to vector<2x128xf32>
    %458 = arith.addf %457, %456 : vector<2x128xf32>
    %459 = arith.divf %457, %458 : vector<2x128xf32>
    %460 = vector.extract_strided_slice %459 {offsets = [0, 0], sizes = [2, 32], strides = [1, 1]} : vector<2x128xf32> to vector<2x32xf32>
    %461 = vector.extract_strided_slice %459 {offsets = [0, 32], sizes = [2, 32], strides = [1, 1]} : vector<2x128xf32> to vector<2x32xf32>
    %462 = vector.extract_strided_slice %459 {offsets = [0, 96], sizes = [2, 32], strides = [1, 1]} : vector<2x128xf32> to vector<2x32xf32>
    %463 = vector.extract_strided_slice %454 {offsets = [0, 64], sizes = [2, 32], strides = [1, 1]} : vector<2x128xf32> to vector<2x32xf32>
    %464 = math.tanh %463 : vector<2x32xf32>
    %465 = arith.mulf %461, %409 : vector<2x32xf32>
    %466 = arith.mulf %460, %464 : vector<2x32xf32>
    %467 = arith.addf %465, %466 : vector<2x32xf32>
    %468 = math.tanh %467 : vector<2x32xf32>
    %469 = arith.mulf %462, %468 : vector<2x32xf32>
    %470 = vector.broadcast %4 : vector<1x32xf32> to vector<2x32xf32>
    %471 = arith.mulf %469, %470 : vector<2x32xf32>
    %cst_79 = arith.constant dense<0.000000e+00> : vector<2xf32>
    %472 = vector.multi_reduction <add>, %471, %cst_79 [1] : vector<2x32xf32> to vector<2xf32>
    %473 = vector.shape_cast %472 : vector<2xf32> to vector<2x1xf32>
    %474 = vector.broadcast %5 : vector<1x1xf32> to vector<2x1xf32>
    %475 = arith.addf %473, %474 : vector<2x1xf32>
    %476 = vector.broadcast %c7_i32 : i32 to vector<2x10xi32>
    %477 = arith.cmpi eq, %13, %476 : vector<2x10xi32>
    %478 = vector.shape_cast %475 : vector<2x1xf32> to vector<2x1xf32>
    %479 = vector.broadcast %478 : vector<2x1xf32> to vector<2x10xf32>
    %480 = arith.select %477, %479, %422 : vector<2x10xi1>, vector<2x10xf32>
    %c8_i32_80 = arith.constant 8 : i32
    %481 = vector.broadcast %c8_i32_80 : i32 to vector<2x8xi32>
    %482 = arith.cmpi eq, %12, %481 : vector<2x8xi32>
    %cst_81 = arith.constant 0.000000e+00 : f32
    %483 = vector.broadcast %cst_81 : f32 to vector<2x8xf32>
    %484 = arith.select %482, %0, %483 : vector<2x8xi1>, vector<2x8xf32>
    %cst_82 = arith.constant dense<0.000000e+00> : vector<2xf32>
    %485 = vector.multi_reduction <add>, %484, %cst_82 [1] : vector<2x8xf32> to vector<2xf32>
    %486 = vector.shape_cast %485 : vector<2xf32> to vector<2x1xf32>
    %c8_i32_83 = arith.constant 8 : i32
    %487 = arith.cmpi slt, %c8_i32_80, %c8_i32_83 : i32
    %488 = arith.select %487, %486, %475 : vector<2x1xf32>
    %489 = vector.broadcast %488 : vector<2x1xf32> to vector<2x128xf32>
    %490 = vector.broadcast %1 : vector<1x128xf32> to vector<2x128xf32>
    %491 = arith.mulf %489, %490 : vector<2x128xf32>
    %cst_84 = arith.constant dense<0.000000e+00> : vector<2x128xf32>
    %492 = tpu.matmul %451, %2, %cst_84 {dimension_numbers = #tpu.dot_dimension_numbers<[1], [0], [0], [1], [0, 0, 1, 1], [], []>} : vector<2x32xf32>, vector<32x128xf32>, vector<2x128xf32> -> vector<2x128xf32>
    %493 = arith.addf %491, %492 : vector<2x128xf32>
    %494 = arith.addf %493, %8 : vector<2x128xf32>
    %495 = arith.negf %494 : vector<2x128xf32>
    %496 = math.exp %495 : vector<2x128xf32>
    %cst_85 = arith.constant 1.000000e+00 : f32
    %497 = vector.broadcast %cst_85 : f32 to vector<2x128xf32>
    %498 = arith.addf %497, %496 : vector<2x128xf32>
    %499 = arith.divf %497, %498 : vector<2x128xf32>
    %500 = vector.extract_strided_slice %499 {offsets = [0, 0], sizes = [2, 32], strides = [1, 1]} : vector<2x128xf32> to vector<2x32xf32>
    %501 = vector.extract_strided_slice %499 {offsets = [0, 32], sizes = [2, 32], strides = [1, 1]} : vector<2x128xf32> to vector<2x32xf32>
    %502 = vector.extract_strided_slice %499 {offsets = [0, 96], sizes = [2, 32], strides = [1, 1]} : vector<2x128xf32> to vector<2x32xf32>
    %503 = vector.extract_strided_slice %494 {offsets = [0, 64], sizes = [2, 32], strides = [1, 1]} : vector<2x128xf32> to vector<2x32xf32>
    %504 = math.tanh %503 : vector<2x32xf32>
    %505 = arith.mulf %501, %449 : vector<2x32xf32>
    %506 = arith.mulf %500, %504 : vector<2x32xf32>
    %507 = arith.addf %505, %506 : vector<2x32xf32>
    %508 = math.tanh %507 : vector<2x32xf32>
    %509 = arith.mulf %502, %508 : vector<2x32xf32>
    %510 = tpu.concatenate %509, %469 in 1 : vector<2x32xf32>, vector<2x32xf32> -> vector<2x64xf32>
    %cst_86 = arith.constant dense<0.000000e+00> : vector<2x128xf32>
    %511 = tpu.matmul %510, %3, %cst_86 {dimension_numbers = #tpu.dot_dimension_numbers<[1], [0], [0], [1], [0, 0, 1, 1], [], []>} : vector<2x64xf32>, vector<64x128xf32>, vector<2x128xf32> -> vector<2x128xf32>
    %512 = arith.addf %511, %11 : vector<2x128xf32>
    %513 = arith.negf %512 : vector<2x128xf32>
    %514 = math.exp %513 : vector<2x128xf32>
    %cst_87 = arith.constant 1.000000e+00 : f32
    %515 = vector.broadcast %cst_87 : f32 to vector<2x128xf32>
    %516 = arith.addf %515, %514 : vector<2x128xf32>
    %517 = arith.divf %515, %516 : vector<2x128xf32>
    %518 = vector.extract_strided_slice %517 {offsets = [0, 0], sizes = [2, 32], strides = [1, 1]} : vector<2x128xf32> to vector<2x32xf32>
    %519 = vector.extract_strided_slice %517 {offsets = [0, 32], sizes = [2, 32], strides = [1, 1]} : vector<2x128xf32> to vector<2x32xf32>
    %520 = vector.extract_strided_slice %517 {offsets = [0, 96], sizes = [2, 32], strides = [1, 1]} : vector<2x128xf32> to vector<2x32xf32>
    %521 = vector.extract_strided_slice %512 {offsets = [0, 64], sizes = [2, 32], strides = [1, 1]} : vector<2x128xf32> to vector<2x32xf32>
    %522 = math.tanh %521 : vector<2x32xf32>
    %523 = arith.mulf %519, %467 : vector<2x32xf32>
    %524 = arith.mulf %518, %522 : vector<2x32xf32>
    %525 = arith.addf %523, %524 : vector<2x32xf32>
    %526 = math.tanh %525 : vector<2x32xf32>
    %527 = arith.mulf %520, %526 : vector<2x32xf32>
    %528 = vector.broadcast %4 : vector<1x32xf32> to vector<2x32xf32>
    %529 = arith.mulf %527, %528 : vector<2x32xf32>
    %cst_88 = arith.constant dense<0.000000e+00> : vector<2xf32>
    %530 = vector.multi_reduction <add>, %529, %cst_88 [1] : vector<2x32xf32> to vector<2xf32>
    %531 = vector.shape_cast %530 : vector<2xf32> to vector<2x1xf32>
    %532 = vector.broadcast %5 : vector<1x1xf32> to vector<2x1xf32>
    %533 = arith.addf %531, %532 : vector<2x1xf32>
    %534 = vector.broadcast %c8_i32_80 : i32 to vector<2x10xi32>
    %535 = arith.cmpi eq, %13, %534 : vector<2x10xi32>
    %536 = vector.shape_cast %533 : vector<2x1xf32> to vector<2x1xf32>
    %537 = vector.broadcast %536 : vector<2x1xf32> to vector<2x10xf32>
    %538 = arith.select %535, %537, %480 : vector<2x10xi1>, vector<2x10xf32>
    %c9_i32 = arith.constant 9 : i32
    %539 = vector.broadcast %c9_i32 : i32 to vector<2x8xi32>
    %540 = arith.cmpi eq, %12, %539 : vector<2x8xi32>
    %cst_89 = arith.constant 0.000000e+00 : f32
    %541 = vector.broadcast %cst_89 : f32 to vector<2x8xf32>
    %542 = arith.select %540, %0, %541 : vector<2x8xi1>, vector<2x8xf32>
    %cst_90 = arith.constant dense<0.000000e+00> : vector<2xf32>
    %543 = vector.multi_reduction <add>, %542, %cst_90 [1] : vector<2x8xf32> to vector<2xf32>
    %544 = vector.shape_cast %543 : vector<2xf32> to vector<2x1xf32>
    %c8_i32_91 = arith.constant 8 : i32
    %545 = arith.cmpi slt, %c9_i32, %c8_i32_91 : i32
    %546 = arith.select %545, %544, %533 : vector<2x1xf32>
    %547 = vector.broadcast %546 : vector<2x1xf32> to vector<2x128xf32>
    %548 = vector.broadcast %1 : vector<1x128xf32> to vector<2x128xf32>
    %549 = arith.mulf %547, %548 : vector<2x128xf32>
    %cst_92 = arith.constant dense<0.000000e+00> : vector<2x128xf32>
    %550 = tpu.matmul %509, %2, %cst_92 {dimension_numbers = #tpu.dot_dimension_numbers<[1], [0], [0], [1], [0, 0, 1, 1], [], []>} : vector<2x32xf32>, vector<32x128xf32>, vector<2x128xf32> -> vector<2x128xf32>
    %551 = arith.addf %549, %550 : vector<2x128xf32>
    %552 = arith.addf %551, %8 : vector<2x128xf32>
    %553 = arith.negf %552 : vector<2x128xf32>
    %554 = math.exp %553 : vector<2x128xf32>
    %cst_93 = arith.constant 1.000000e+00 : f32
    %555 = vector.broadcast %cst_93 : f32 to vector<2x128xf32>
    %556 = arith.addf %555, %554 : vector<2x128xf32>
    %557 = arith.divf %555, %556 : vector<2x128xf32>
    %558 = vector.extract_strided_slice %557 {offsets = [0, 0], sizes = [2, 32], strides = [1, 1]} : vector<2x128xf32> to vector<2x32xf32>
    %559 = vector.extract_strided_slice %557 {offsets = [0, 32], sizes = [2, 32], strides = [1, 1]} : vector<2x128xf32> to vector<2x32xf32>
    %560 = vector.extract_strided_slice %557 {offsets = [0, 96], sizes = [2, 32], strides = [1, 1]} : vector<2x128xf32> to vector<2x32xf32>
    %561 = vector.extract_strided_slice %552 {offsets = [0, 64], sizes = [2, 32], strides = [1, 1]} : vector<2x128xf32> to vector<2x32xf32>
    %562 = math.tanh %561 : vector<2x32xf32>
    %563 = arith.mulf %559, %507 : vector<2x32xf32>
    %564 = arith.mulf %558, %562 : vector<2x32xf32>
    %565 = arith.addf %563, %564 : vector<2x32xf32>
    %566 = math.tanh %565 : vector<2x32xf32>
    %567 = arith.mulf %560, %566 : vector<2x32xf32>
    %568 = tpu.concatenate %567, %527 in 1 : vector<2x32xf32>, vector<2x32xf32> -> vector<2x64xf32>
    %cst_94 = arith.constant dense<0.000000e+00> : vector<2x128xf32>
    %569 = tpu.matmul %568, %3, %cst_94 {dimension_numbers = #tpu.dot_dimension_numbers<[1], [0], [0], [1], [0, 0, 1, 1], [], []>} : vector<2x64xf32>, vector<64x128xf32>, vector<2x128xf32> -> vector<2x128xf32>
    %570 = arith.addf %569, %11 : vector<2x128xf32>
    %571 = arith.negf %570 : vector<2x128xf32>
    %572 = math.exp %571 : vector<2x128xf32>
    %cst_95 = arith.constant 1.000000e+00 : f32
    %573 = vector.broadcast %cst_95 : f32 to vector<2x128xf32>
    %574 = arith.addf %573, %572 : vector<2x128xf32>
    %575 = arith.divf %573, %574 : vector<2x128xf32>
    %576 = vector.extract_strided_slice %575 {offsets = [0, 0], sizes = [2, 32], strides = [1, 1]} : vector<2x128xf32> to vector<2x32xf32>
    %577 = vector.extract_strided_slice %575 {offsets = [0, 32], sizes = [2, 32], strides = [1, 1]} : vector<2x128xf32> to vector<2x32xf32>
    %578 = vector.extract_strided_slice %575 {offsets = [0, 96], sizes = [2, 32], strides = [1, 1]} : vector<2x128xf32> to vector<2x32xf32>
    %579 = vector.extract_strided_slice %570 {offsets = [0, 64], sizes = [2, 32], strides = [1, 1]} : vector<2x128xf32> to vector<2x32xf32>
    %580 = math.tanh %579 : vector<2x32xf32>
    %581 = arith.mulf %577, %525 : vector<2x32xf32>
    %582 = arith.mulf %576, %580 : vector<2x32xf32>
    %583 = arith.addf %581, %582 : vector<2x32xf32>
    %584 = math.tanh %583 : vector<2x32xf32>
    %585 = arith.mulf %578, %584 : vector<2x32xf32>
    %586 = vector.broadcast %4 : vector<1x32xf32> to vector<2x32xf32>
    %587 = arith.mulf %585, %586 : vector<2x32xf32>
    %cst_96 = arith.constant dense<0.000000e+00> : vector<2xf32>
    %588 = vector.multi_reduction <add>, %587, %cst_96 [1] : vector<2x32xf32> to vector<2xf32>
    %589 = vector.shape_cast %588 : vector<2xf32> to vector<2x1xf32>
    %590 = vector.broadcast %5 : vector<1x1xf32> to vector<2x1xf32>
    %591 = arith.addf %589, %590 : vector<2x1xf32>
    %592 = vector.broadcast %c9_i32 : i32 to vector<2x10xi32>
    %593 = arith.cmpi eq, %13, %592 : vector<2x10xi32>
    %594 = vector.shape_cast %591 : vector<2x1xf32> to vector<2x1xf32>
    %595 = vector.broadcast %594 : vector<2x1xf32> to vector<2x10xf32>
    %596 = arith.select %593, %595, %538 : vector<2x10xi1>, vector<2x10xf32>
    %c10_i32 = arith.constant 10 : i32
    %c0_97 = arith.constant 0 : index
    %c0_98 = arith.constant 0 : index
    %597 = vector.load %arg8[%c0_97, %c0_98] : memref<2x10xf32, #tpu.memory_space<vmem>>, vector<2x10xf32>
    tpu.vector_store %arg8[%c0_97, %c0_98], %596 {strides = array<i32>} : memref<2x10xf32, #tpu.memory_space<vmem>>, vector<2x10xf32>,
    return
  }
}

</mosaic_0001>

<bundles_post_ra>
// kernel: tpu_custom_call.1
= control target key start
LH: loop header
LB: loop body
LE: loop exit
PB: predicated region body
PF: predicated region fallthrough
CT: control target
= control target key end

     0   :  { %s3899_s0 = inlined_call_operand.vmem [shape: f32[2,8], index: 0, kind: input, shape index: {}]   ;;  %s3900_s1 = inlined_call_operand.vmem [shape: f32[1,128], index: 1, kind: input, shape index: {}]   ;;  %s3901_s2 = inlined_call_operand.hbm [shape: f32[32,128], index: 2, kind: input, shape index: {}]   ;;  %s3902_s3 = inlined_call_operand.vmem [shape: f32[1,128], index: 3, kind: input, shape index: {}]   ;;  %s3903_s4 = inlined_call_operand.hbm [shape: f32[64,128], index: 4, kind: input, shape index: {}]   ;;  %s3904_s5 = inlined_call_operand.vmem [shape: f32[1,128], index: 5, kind: input, shape index: {}]   ;;  %s3905_s6 = inlined_call_operand.vmem [shape: f32[1,32], index: 6, kind: input, shape index: {}]   ;;  %s3906_s7 = inlined_call_operand.<no memory space> [shape: f32[1,1], index: 7, kind: input, shape index: {}]   ;;  %s3907_s8 = inlined_call_operand.hbm [shape: f32[2,10], index: 8, kind: output, shape index: {}]  }
   0x1   :  { %v13_v0 = vstv %s3906_s7 }
   0x2   :  { %14 = vst [vmem:[#allocation2] sm:$0x1] %v13_v0 }
   0x3   :  { %15 = vsyncpa [#allocation4], 0 }
   0x4   :  { %16 = vsyncpa [#allocation7], 0 }
   0x5   :  { %17 = vsyncpa [#allocation5], 0  ;;  %s3112_s29 = smov [#allocation3]  }
   0x6   :  { %s27_s30 = sshll.u32 %s3112_s29, 4  ;;  %s28_s30 = int_to_ptr.vmem [resolvable:$true] %s27_s30 }
   0x7   :  { %s3054_s9 = scalar_lea.vmem %s28_s30, 512  ;;  %p3059_p1 = scmp.lt.s32.totalorder %s28_s30, %s28_s30 }
   0x8   :  { %p3055_p0 = scmp.ne.s32.totalorder %s28_s30, %s3054_s9  ;;  %p3060_p2 = scmp.lt.s32.totalorder %s3054_s9, %s3054_s9 }
   0xa   :  { %p3061_p3 = por %p3060_p2, %p3059_p1 }
   0xc   :  { %p3062_p4 = pnand %p3061_p3, %p3055_p0 }
   0xe   :  { %3065 = shalt.err (!%p3062_p4)
}
   0xf   :  { %s3113_s10 = smov 128   ;;  %s3114_s11 = smov 8  }
  0x10   :  { %33 = dma.hbm_to_vmem [thread:$0]  %s3901_s2, 512, %s28_s30, [#allocation4], %s3113_s10, %s3113_s10, %s3114_s11  }
  0x11   :  { %s3115_s7 = smov [#allocation6]  }
  0x12   :  { %s41_s14 = sshll.u32 %s3115_s7, 4  ;;  %s42_s14 = int_to_ptr.vmem [resolvable:$true] %s41_s14 }
  0x13   :  { %s3074_s15 = scalar_lea.vmem %s42_s14, 1024  ;;  %p3079_p6 = scmp.lt.s32.totalorder %s42_s14, %s42_s14 }
  0x14   :  { %p3075_p5 = scmp.ne.s32.totalorder %s42_s14, %s3074_s15  ;;  %p3080_p7 = scmp.lt.s32.totalorder %s3074_s15, %s3074_s15 }
  0x16   :  { %p3081_p8 = por %p3080_p7, %p3079_p6 }
  0x18   :  { %p3082_p9 = pnand %p3081_p8, %p3075_p5 }
  0x1a   :  { %3085 = shalt.err (!%p3082_p9)
}
  0x1b   :  { %47 = dma.hbm_to_vmem [thread:$0]  %s3903_s4, 1024, %s42_s14, [#allocation7], %s3113_s10, %s3113_s10, %s3114_s11  }
  0x1c   :  { %3106 = dma.done.wait [#allocation4], 512  }
  0x1d   :  { %3107 = vsyncadd [#allocation4], 4294966784 }
  0x1e   :  { %3108 = dma.done.wait [#allocation7], 1024  }
  0x1f   :  { %3109 = vsyncadd [#allocation7], 4294966272  ;;  %v90_v1 = vlaneseq  ;;  %v3116_v2 = vmov 0.0   ;;  %vm3117_vm0 = vmmov 0   ;;  %v3186_v4 = vld [vmem:[#allocation3 + $0x18] sm:$0xff]  ;;  %v3188_v5 = vld [vmem:[#allocation3 + $0x10] sm:$0xff] }
  0x20   :  { %2557 = vmatprep.subr.mxu1 %v3116_v2  ;;  %2565 = vmatprep.mubr.msk.f32.mxu1 %vm3117_vm0, %v3116_v2  ;;  %vm94_vm2 = vcmask 58368   ;;  %v3194_v6 = vld [vmem:[%s3899_s0] sm:$0x3]  ;;  %v3198_v7 = vld [vmem:[#allocation3 + $0x8] sm:$0xff]  ;;  %s3118_s22 = smov 64   ;;  %s3119_s23 = smov 32  }
  0x21   :  { %v3180_v3 = vand.u32 127, %v90_v1  ;;  %2587 = vmatprep.subr.mxu0 %v3116_v2  ;;  %2595 = vmatprep.mubr.msk.f32.mxu0 %vm3117_vm0, %v3116_v2  ;;  %v3208_v10 = vld [vmem:[#allocation3] sm:$0xff]  ;;  %v3225_v11 = vld [vmem:[%s3900_s1] ss:$0 sm:$0xff]  ;;  %v3241_v30 = vld [vmem:[#allocation6 + $0x30] sm:$0xff]  ;;  %vm105_vm4 = vcmask 261120  }
  0x22   :  { %2558 = vmatpush3.msra.mxu1 %v3186_v4  ;;  %2588 = vmatpush3.msra.mxu0 %v3186_v4  ;;  %v3231_v14 = vld [vmem:[%s3902_s3] ss:$0 sm:$0xff]  ;;  %v3245_v31 = vld [vmem:[#allocation6 + $0x28] sm:$0xff]  ;;  %v3249_v32 = vld [vmem:[#allocation6 + $0x20] sm:$0xff]  ;;  %vm210_vm5 = vcmask 523264   ;;  %s3120_s10 = smov 96  }
  0x23   :  { %vm92_vm1 = vcmp.eq.s32.totalorder %v3180_v3, 0  ;;  %2559 = vmatprep.subr.mxu1 %v3116_v2  ;;  %2589 = vmatprep.subr.mxu0 %v3116_v2  ;;  %v3239_v29 = vld [vmem:[#allocation6 + $0x38] sm:$0xff]  ;;  %v3257_v34 = vld [vmem:[#allocation6 + $0x10] sm:$0xff]  ;;  %v3261_v36 = vld [vmem:[#allocation6 + $0x8] sm:$0xff]  ;;  %vm338_vm3 = vcmp.eq.s32.totalorder %v3180_v3, 1  ;;  %vm563_vm6 = vcmp.eq.s32.totalorder %v3180_v3, 2 }
  0x24   :  { %v93_v8 = vsel %vm92_vm1, %v3194_v6, 0.0  ;;  %2560 = vmatpush3.msra.mxu1 %v3188_v5  ;;  %2590 = vmatpush3.msra.mxu0 %v3188_v5  ;;  %v3253_v33 = vld [vmem:[#allocation6 + $0x18] sm:$0xff]  ;;  %v3268_v37 = vld [vmem:[#allocation6] sm:$0xff]  ;;  %v339_v40 = vsel %vm338_vm3, %v3194_v6, 0.0  ;;  %vm788_vm7 = vcmp.eq.s32.totalorder %v3180_v3, 3  ;;  %vm1013_vm8 = vcmp.eq.s32.totalorder %v3180_v3, 4 }
  0x25   :  { %v95_v9 = vsel %vm94_vm2, %v93_v8, 0.0  ;;  %2561 = vmatprep.subr.mxu1 %v3116_v2  ;;  %2591 = vmatprep.subr.mxu0 %v3116_v2  ;;  %v340_v41 = vsel %vm94_vm2, %v339_v40, 0.0  ;;  %v3313_v49 = vld [vmem:[%s3904_s5] ss:$0 sm:$0xff]  ;;  %vm1238_vm9 = vcmp.eq.s32.totalorder %v3180_v3, 5  ;;  %vm1463_vm10 = vcmp.eq.s32.totalorder %v3180_v3, 6 }
  0x26   :  { %96 = vadd.xlane.f32.xlu0 %v95_v9  ;;  %2562 = vmatpush3.msra.mxu1 %v3198_v7  ;;  %vm1688_vm11 = vcmp.eq.s32.totalorder %v3180_v3, 7  ;;  %vm321_vm12 = vcmask 254976   ;;  %vm2127_vm13 = vcmp.eq.s32.totalorder %v3180_v3, 8  ;;  %vm2348_vm14 = vcmp.eq.s32.totalorder %v3180_v3, 9 }
  0x27   :  { %2563 = vmatprep.subr.mxu1 %v3116_v2  ;;  %2592 = vmatpush3.msra.mxu0 %v3198_v7  ;;  %vm2355_vm15 = vcmask 74752  }
  0x28   :  { %2564 = vmatpush3.msra.mxu1 %v3208_v10  ;;  %2593 = vmatprep.subr.mxu0 %v3116_v2 }
  0x29   :  { %2566 = vmatmul.mubr.f32.vlgmr.msra.gmra.mxu1 %v3116_v2  ;;  %2568 = vmatprep.subr.mxu1 %v3116_v2 }
  0x2a   :  { %2594 = vmatpush3.msra.mxu0 %v3208_v10  ;;  %2584 = vmatprep.mubr.msk.f32.mxu1 %vm3117_vm0, %v3116_v2 }
  0x2b   :  { %2598 = vmatprep.subr.mxu0 %v3116_v2  ;;  %2569 = vmatpush3.msra.mxu1 %v3239_v29 }
  0x2c   :  { %2570 = vmatprep.subr.mxu1 %v3116_v2 }
  0x2d   :  { %2571 = vmatpush3.msra.mxu1 %v3241_v30 }
  0x2e   :  { %2572 = vmatprep.subr.mxu1 %v3116_v2 }
  0x2f   :  { %2573 = vmatpush3.msra.mxu1 %v3245_v31 }
  0x30   :  { %2574 = vmatprep.subr.mxu1 %v3116_v2 }
  0x31   :  { %2575 = vmatpush3.msra.mxu1 %v3249_v32 }
  0x32   :  { %2576 = vmatprep.subr.mxu1 %v3116_v2 }
  0x33   :  { %2577 = vmatpush3.msra.mxu1 %v3253_v33 }
  0x34   :  { %2578 = vmatprep.subr.mxu1 %v3116_v2 }
  0x35   :  { %2579 = vmatpush3.msra.mxu1 %v3257_v34 }
  0x36   :  { %2580 = vmatprep.subr.mxu1 %v3116_v2 }
  0x37   :  { %2581 = vmatpush3.msra.mxu1 %v3261_v36 }
  0x38   :  { %2582 = vmatprep.subr.mxu1 %v3116_v2 }
  0x39   :  { %2583 = vmatpush3.msra.mxu1 %v3268_v37 }
  0x3a   :  { %2617 = vmatprep.subr.mxu1 %v3116_v2 }
  0xaf   :  { %v97_v12 = vpop.xlane.xlu0 %96 }
  0xb0   :  { %v104_v13 = vmul.f32 %v3225_v11, %v97_v12 }
  0xe9   :  { %v175_v15 = vpop.f32.mrf.mxu1 }
  0xea   :  { %v179_v16 = vadd.f32 %v175_v15, %v104_v13 }
  0xeb   :  { %v2567_v17 = vpop.f32.mrf.mxu1 }
  0xec   :  { %v180_v18 = vadd.f32 %v3231_v14, %v179_v16 }
  0xee   :  { %2870 = vtanh.f32 %v180_v18  ;;  %v2376_v20 = vmul.f32 -1.442695, %v180_v18 }
  0xf0   :  { %2872 = vpow2.f32 %v2376_v20 }
  0xfb   :  { %v2871_v19 = vpop.eup %2870 }
  0xfc   :  { %190 = vrot.lane.b32.xlu0 %v2871_v19, %s3118_s22 }
  0xfd   :  { %v2873_v21 = vpop.eup %2872 }
  0xfe   :  { %v184_v22 = vadd.f32 1.0, %v2873_v21 }
 0x100   :  { %2874 = vrcp.f32 %v184_v22 }
 0x10d   :  { %v2875_v23 = vpop.eup %2874 }
 0x10e   :  { %v188_v26 = vmul.f32 0.0, %v2875_v23 }
 0x16e   :  { %v191_v24 = vpop.permute.xlu0 %190 }
 0x16f   :  { %v193_v25 = vmul.f32 %v2875_v23, %v191_v24 }
 0x171   :  { %195 = vrot.lane.b32.xlu1 %v193_v25, %s3119_s23  ;;  %v564_v25 = vsel %vm563_vm6, %v3194_v6, 0.0 }
 0x1e3   :  { %v196_v27 = vpop.permute.xlu1 %195 }
 0x1e4   :  { %v3236_v28 = vadd.f32 %v196_v27, %v188_v26  ;;  %v565_v26 = vsel %vm94_vm2, %v564_v25, 0.0 }
 0x1e6   :  { %2876 = vtanh.f32 %v3236_v28 }
 0x1f3   :  { %v2877_v35 = vpop.eup %2876 }
 0x1f4   :  { %201 = vrot.lane.b32.xlu1 %v2877_v35, %s3118_s22 }
 0x266   :  { %v202_v38 = vpop.permute.xlu1 %201 }
 0x267   :  { %v204_v39 = vmul.f32 %v2875_v23, %v202_v38 }
 0x269   :  { %206 = vrot.lane.b32.xlu1 %v204_v39, %s3119_s23 }
 0x28d   :  { %341 = vadd.xlane.f32.xlu1 %v340_v41 }
 0x2db   :  { %v207_v42 = vpop.permute.xlu1 %206 }
 0x2dc   :  { %v209_v43 = vsel %vm105_vm4, %v207_v42, 0.0  ;;  %2596 = vmatmul.mubr.msk.f32.vlgmr.msra.gmra.mxu0 %vm105_vm4, %v207_v42 }
 0x2dd   :  { %2585 = vmatmul.mubr.msk.f32.vlgmr.msra.gmra.mxu1 %vm210_vm5, %v209_v43  ;;  %2599 = vmatpush3.msra.mxu0 %v3239_v29 }
 0x2de   :  { %2600 = vmatprep.subr.mxu0 %v3116_v2  ;;  %2618 = vmatpush3.msra.mxu1 %v3186_v4 }
 0x2df   :  { %2601 = vmatpush3.msra.mxu0 %v3241_v30  ;;  %2619 = vmatprep.subr.mxu1 %v3116_v2 }
 0x2e0   :  { %2602 = vmatprep.subr.mxu0 %v3116_v2  ;;  %2620 = vmatpush3.msra.mxu1 %v3188_v5 }
 0x2e1   :  { %2603 = vmatpush3.msra.mxu0 %v3245_v31  ;;  %2621 = vmatprep.subr.mxu1 %v3116_v2 }
 0x2e2   :  { %2604 = vmatprep.subr.mxu0 %v3116_v2  ;;  %2622 = vmatpush3.msra.mxu1 %v3198_v7 }
 0x2e3   :  { %2605 = vmatpush3.msra.mxu0 %v3249_v32  ;;  %2623 = vmatprep.subr.mxu1 %v3116_v2 }
 0x2e4   :  { %2606 = vmatprep.subr.mxu0 %v3116_v2  ;;  %2624 = vmatpush3.msra.mxu1 %v3208_v10 }
 0x2e5   :  { %2607 = vmatpush3.msra.mxu0 %v3253_v33  ;;  %2625 = vmatprep.mubr.msk.f32.mxu1 %vm3117_vm0, %v3116_v2 }
 0x2e6   :  { %2608 = vmatprep.subr.mxu0 %v3116_v2  ;;  %2614 = vmatprep.mubr.msk.f32.mxu0 %vm3117_vm0, %v3116_v2 }
 0x2e7   :  { %2609 = vmatpush3.msra.mxu0 %v3257_v34  ;;  %2628 = vmatprep.subr.mxu1 %v3116_v2 }
 0x2e8   :  { %2610 = vmatprep.subr.mxu0 %v3116_v2 }
 0x2e9   :  { %2611 = vmatpush3.msra.mxu0 %v3261_v36 }
 0x2ea   :  { %2612 = vmatprep.subr.mxu0 %v3116_v2 }
 0x2eb   :  { %2613 = vmatpush3.msra.mxu0 %v3268_v37 }
 0x2ec   :  { %2647 = vmatprep.subr.mxu0 %v3116_v2 }
 0x316   :  { %v342_v44 = vpop.xlane.xlu1 %341 }
 0x317   :  { %v343_v45 = vmul.f32 %v3225_v11, %v342_v44 }
 0x39c   :  { %v412_v46 = vpop.f32.mrf.mxu0 }
 0x39d   :  { %v416_v47 = vadd.f32 %v412_v46, %v343_v45  ;;  %v280_v48 = vpop.f32.mrf.mxu1 }
 0x39e   :  { %v2597_v50 = vpop.f32.mrf.mxu0  ;;  %v281_v53 = vadd.f32 %v3313_v49, %v280_v48 }
 0x39f   :  { %v417_v51 = vadd.f32 %v3231_v14, %v416_v47  ;;  %v2586_v52 = vpop.f32.mrf.mxu1 }
 0x3a0   :  { %v2378_v57 = vmul.f32 -1.442695, %v281_v53 }
 0x3a1   :  { %2878 = vtanh.f32 %v417_v51  ;;  %v2382_v56 = vmul.f32 -1.442695, %v417_v51 }
 0x3a2   :  { %2880 = vtanh.f32 %v281_v53 }
 0x3a3   :  { %2882 = vpow2.f32 %v2382_v56 }
 0x3a4   :  { %2884 = vpow2.f32 %v2378_v57 }
 0x3ae   :  { %v2879_v54 = vpop.eup %2878 }
 0x3af   :  { %427 = vrot.lane.b32.xlu0 %v2879_v54, %s3118_s22  ;;  %v2881_v55 = vpop.eup %2880 }
 0x3b0   :  { %v2883_v58 = vpop.eup %2882 }
 0x3b1   :  { %v421_v59 = vadd.f32 1.0, %v2883_v58  ;;  %v2885_v60 = vpop.eup %2884 }
 0x3b2   :  { %v287_v61 = vadd.f32 1.0, %v2885_v60 }
 0x3b3   :  { %293 = vrot.lane.b32.xlu0 %v2881_v55, %s3118_s22  ;;  %2886 = vrcp.f32 %v421_v59 }
 0x3b4   :  { %2888 = vrcp.f32 %v287_v61 }
 0x3c0   :  { %v2887_v62 = vpop.eup %2886 }
 0x3c1   :  { %v2889_v1 = vpop.eup %2888  ;;  %v425_v12 = vmul.f32 %v2887_v62, %v3236_v28 }
 0x3c2   :  { %v291_v16 = vmul.f32 0.0, %v2889_v1 }
 0x421   :  { %v428_v63 = vpop.permute.xlu0 %427 }
 0x422   :  { %v430_v0 = vmul.f32 %v2887_v62, %v428_v63 }
 0x424   :  { %432 = vrot.lane.b32.xlu0 %v430_v0, %s3119_s23 }
 0x425   :  { %v294_v8 = vpop.permute.xlu0 %293 }
 0x426   :  { %v296_v9 = vmul.f32 %v2889_v1, %v294_v8 }
 0x428   :  { %298 = vrot.lane.b32.xlu0 %v296_v9, %s3119_s23 }
 0x496   :  { %v433_v13 = vpop.permute.xlu0 %432 }
 0x497   :  { %v3322_v15 = vadd.f32 %v433_v13, %v425_v12 }
 0x499   :  { %2890 = vtanh.f32 %v3322_v15 }
 0x49a   :  { %v299_v17 = vpop.permute.xlu0 %298 }
 0x49b   :  { %v3325_v18 = vadd.f32 %v299_v17, %v291_v16 }
 0x49d   :  { %2892 = vtanh.f32 %v3325_v18 }
 0x4a6   :  { %v2891_v19 = vpop.eup %2890 }
 0x4a7   :  { %438 = vrot.lane.b32.xlu0 %v2891_v19, %s3118_s22 }
 0x4aa   :  { %v2893_v20 = vpop.eup %2892 }
 0x4ab   :  { %304 = vrot.lane.b32.xlu0 %v2893_v20, %s3118_s22 }
 0x519   :  { %v439_v21 = vpop.permute.xlu0 %438 }
 0x51a   :  { %v441_v22 = vmul.f32 %v2887_v62, %v439_v21 }
 0x51c   :  { %443 = vrot.lane.b32.xlu1 %v441_v22, %s3119_s23 }
 0x51d   :  { %v305_v23 = vpop.permute.xlu0 %304 }
 0x51e   :  { %v3331_v24 = vmul.f32 %v2889_v1, %v305_v23 }
 0x520   :  { %447 = vrot.lane.b32.xlu0 %v3331_v24, %s3118_s22 }
 0x53f   :  { %566 = vadd.xlane.f32.xlu0 %v565_v26 }
 0x58e   :  { %v444_v27 = vpop.permute.xlu1 %443 }
 0x58f   :  { %2626 = vmatmul.mubr.msk.f32.vlgmr.msra.gmra.mxu1 %vm105_vm4, %v444_v27 }
 0x590   :  { %2629 = vmatpush3.msra.mxu1 %v3239_v29  ;;  %2644 = vmatprep.mubr.msk.f32.mxu1 %vm3117_vm0, %v3116_v2 }
 0x591   :  { %2630 = vmatprep.subr.mxu1 %v3116_v2 }
 0x592   :  { %v448_v28 = vpop.permute.xlu0 %447  ;;  %2631 = vmatpush3.msra.mxu1 %v3241_v30 }
 0x593   :  { %v450_v35 = vsel %vm105_vm4, %v444_v27, %v448_v28  ;;  %2632 = vmatprep.subr.mxu1 %v3116_v2 }
 0x594   :  { %2615 = vmatmul.mubr.msk.f32.vlgmr.msra.gmra.mxu0 %vm210_vm5, %v450_v35  ;;  %2633 = vmatpush3.msra.mxu1 %v3245_v31 }
 0x595   :  { %2648 = vmatpush3.msra.mxu0 %v3186_v4  ;;  %2634 = vmatprep.subr.mxu1 %v3116_v2 }
 0x596   :  { %2649 = vmatprep.subr.mxu0 %v3116_v2  ;;  %2635 = vmatpush3.msra.mxu1 %v3249_v32 }
 0x597   :  { %2650 = vmatpush3.msra.mxu0 %v3188_v5  ;;  %2636 = vmatprep.subr.mxu1 %v3116_v2 }
 0x598   :  { %2651 = vmatprep.subr.mxu0 %v3116_v2  ;;  %2637 = vmatpush3.msra.mxu1 %v3253_v33 }
 0x599   :  { %2652 = vmatpush3.msra.mxu0 %v3198_v7  ;;  %2638 = vmatprep.subr.mxu1 %v3116_v2 }
 0x59a   :  { %2653 = vmatprep.subr.mxu0 %v3116_v2  ;;  %2655 = vmatprep.mubr.msk.f32.mxu0 %vm3117_vm0, %v3116_v2 }
 0x59b   :  { %2654 = vmatpush3.msra.mxu0 %v3208_v10  ;;  %2639 = vmatpush3.msra.mxu1 %v3257_v34 }
 0x59c   :  { %2640 = vmatprep.subr.mxu1 %v3116_v2  ;;  %2658 = vmatprep.subr.mxu0 %v3116_v2 }
 0x59d   :  { %2641 = vmatpush3.msra.mxu1 %v3261_v36 }
 0x59e   :  { %2642 = vmatprep.subr.mxu1 %v3116_v2 }
 0x59f   :  { %2643 = vmatpush3.msra.mxu1 %v3268_v37 }
 0x5a0   :  { %2677 = vmatprep.subr.mxu1 %v3116_v2 }
 0x5c8   :  { %v567_v38 = vpop.xlane.xlu0 %566 }
 0x5c9   :  { %v568_v39 = vmul.f32 %v3225_v11, %v567_v38 }
 0x64f   :  { %v637_v40 = vpop.f32.mrf.mxu1 }
 0x650   :  { %v641_v41 = vadd.f32 %v637_v40, %v568_v39 }
 0x651   :  { %v2627_v42 = vpop.f32.mrf.mxu1 }
 0x652   :  { %v642_v43 = vadd.f32 %v3231_v14, %v641_v41 }
 0x654   :  { %2894 = vtanh.f32 %v642_v43  ;;  %v520_v44 = vpop.f32.mrf.mxu0  ;;  %v2386_v50 = vmul.f32 -1.442695, %v642_v43 }
 0x655   :  { %v521_v45 = vadd.f32 %v3313_v49, %v520_v44 }
 0x656   :  { %v2616_v46 = vpop.f32.mrf.mxu0 }
 0x657   :  { %2896 = vtanh.f32 %v521_v45  ;;  %v2384_v51 = vmul.f32 -1.442695, %v521_v45 }
 0x658   :  { %2898 = vpow2.f32 %v2386_v50 }
 0x659   :  { %2900 = vpow2.f32 %v2384_v51 }
 0x661   :  { %v2895_v47 = vpop.eup %2894 }
 0x662   :  { %652 = vrot.lane.b32.xlu1 %v2895_v47, %s3118_s22 }
 0x664   :  { %v2897_v48 = vpop.eup %2896 }
 0x665   :  { %v2899_v52 = vpop.eup %2898 }
 0x666   :  { %533 = vrot.lane.b32.xlu1 %v2897_v48, %s3118_s22  ;;  %v646_v53 = vadd.f32 1.0, %v2899_v52  ;;  %v2901_v54 = vpop.eup %2900 }
 0x667   :  { %v527_v55 = vadd.f32 1.0, %v2901_v54 }
 0x668   :  { %2902 = vrcp.f32 %v646_v53 }
 0x669   :  { %2904 = vrcp.f32 %v527_v55 }
 0x675   :  { %v2903_v56 = vpop.eup %2902 }
 0x676   :  { %v2905_v59 = vpop.eup %2904  ;;  %v650_v62 = vmul.f32 %v2903_v56, %v3322_v15 }
 0x677   :  { %v531_v1 = vmul.f32 %v2905_v59, %v3325_v18  ;;  %v789_v18 = vsel %vm788_vm7, %v3194_v6, 0.0 }
 0x678   :  { %v790_v20 = vsel %vm94_vm2, %v789_v18, 0.0 }
 0x6d4   :  { %v653_v57 = vpop.permute.xlu1 %652 }
 0x6d5   :  { %v655_v58 = vmul.f32 %v2903_v56, %v653_v57 }
 0x6d7   :  { %657 = vrot.lane.b32.xlu1 %v655_v58, %s3119_s23 }
 0x6d8   :  { %v534_v60 = vpop.permute.xlu1 %533 }
 0x6d9   :  { %v536_v61 = vmul.f32 %v2905_v59, %v534_v60 }
 0x6db   :  { %538 = vrot.lane.b32.xlu1 %v536_v61, %s3119_s23 }
 0x749   :  { %v658_v63 = vpop.permute.xlu1 %657 }
 0x74a   :  { %v3379_v0 = vadd.f32 %v658_v63, %v650_v62 }
 0x74c   :  { %2906 = vtanh.f32 %v3379_v0 }
 0x74d   :  { %v539_v8 = vpop.permute.xlu1 %538 }
 0x74e   :  { %v3383_v9 = vadd.f32 %v539_v8, %v531_v1 }
 0x750   :  { %2908 = vtanh.f32 %v3383_v9 }
 0x759   :  { %v2907_v12 = vpop.eup %2906 }
 0x75a   :  { %663 = vrot.lane.b32.xlu1 %v2907_v12, %s3118_s22 }
 0x75d   :  { %v2909_v13 = vpop.eup %2908 }
 0x75e   :  { %544 = vrot.lane.b32.xlu0 %v2909_v13, %s3118_s22 }
 0x7cc   :  { %v664_v16 = vpop.permute.xlu1 %663 }
 0x7cd   :  { %v666_v15 = vmul.f32 %v2903_v56, %v664_v16 }
 0x7cf   :  { %668 = vrot.lane.b32.xlu1 %v666_v15, %s3119_s23 }
 0x7d0   :  { %v545_v17 = vpop.permute.xlu0 %544 }
 0x7d1   :  { %v3389_v19 = vmul.f32 %v2905_v59, %v545_v17 }
 0x7d3   :  { %672 = vrot.lane.b32.xlu1 %v3389_v19, %s3118_s22 }
 0x7f7   :  { %791 = vadd.xlane.f32.xlu1 %v790_v20 }
 0x841   :  { %v669_v21 = vpop.permute.xlu1 %668 }
 0x842   :  { %2656 = vmatmul.mubr.msk.f32.vlgmr.msra.gmra.mxu0 %vm105_vm4, %v669_v21 }
 0x843   :  { %2659 = vmatpush3.msra.mxu0 %v3239_v29  ;;  %2674 = vmatprep.mubr.msk.f32.mxu0 %vm3117_vm0, %v3116_v2 }
 0x844   :  { %2660 = vmatprep.subr.mxu0 %v3116_v2 }
 0x845   :  { %v673_v22 = vpop.permute.xlu1 %672  ;;  %2661 = vmatpush3.msra.mxu0 %v3241_v30 }
 0x846   :  { %v675_v23 = vsel %vm105_vm4, %v669_v21, %v673_v22  ;;  %2662 = vmatprep.subr.mxu0 %v3116_v2 }
 0x847   :  { %2645 = vmatmul.mubr.msk.f32.vlgmr.msra.gmra.mxu1 %vm210_vm5, %v675_v23  ;;  %2663 = vmatpush3.msra.mxu0 %v3245_v31 }
 0x848   :  { %2678 = vmatpush3.msra.mxu1 %v3186_v4  ;;  %2664 = vmatprep.subr.mxu0 %v3116_v2 }
 0x849   :  { %2679 = vmatprep.subr.mxu1 %v3116_v2  ;;  %2665 = vmatpush3.msra.mxu0 %v3249_v32 }
 0x84a   :  { %2680 = vmatpush3.msra.mxu1 %v3188_v5  ;;  %2666 = vmatprep.subr.mxu0 %v3116_v2 }
 0x84b   :  { %2681 = vmatprep.subr.mxu1 %v3116_v2  ;;  %2667 = vmatpush3.msra.mxu0 %v3253_v33 }
 0x84c   :  { %2682 = vmatpush3.msra.mxu1 %v3198_v7  ;;  %2668 = vmatprep.subr.mxu0 %v3116_v2 }
 0x84d   :  { %2683 = vmatprep.subr.mxu1 %v3116_v2  ;;  %2685 = vmatprep.mubr.msk.f32.mxu1 %vm3117_vm0, %v3116_v2 }
 0x84e   :  { %2684 = vmatpush3.msra.mxu1 %v3208_v10  ;;  %2669 = vmatpush3.msra.mxu0 %v3257_v34 }
 0x84f   :  { %2670 = vmatprep.subr.mxu0 %v3116_v2  ;;  %2688 = vmatprep.subr.mxu1 %v3116_v2 }
 0x850   :  { %2671 = vmatpush3.msra.mxu0 %v3261_v36 }
 0x851   :  { %2672 = vmatprep.subr.mxu0 %v3116_v2 }
 0x852   :  { %2673 = vmatpush3.msra.mxu0 %v3268_v37 }
 0x853   :  { %2707 = vmatprep.subr.mxu0 %v3116_v2 }
 0x880   :  { %v792_v25 = vpop.xlane.xlu1 %791 }
 0x881   :  { %v793_v26 = vmul.f32 %v3225_v11, %v792_v25 }
 0x902   :  { %v862_v27 = vpop.f32.mrf.mxu0 }
 0x903   :  { %v866_v28 = vadd.f32 %v862_v27, %v793_v26 }
 0x904   :  { %v2657_v35 = vpop.f32.mrf.mxu0 }
 0x905   :  { %v867_v38 = vadd.f32 %v3231_v14, %v866_v28 }
 0x907   :  { %2910 = vtanh.f32 %v867_v38  ;;  %v745_v39 = vpop.f32.mrf.mxu1  ;;  %v2390_v44 = vmul.f32 -1.442695, %v867_v38 }
 0x908   :  { %v746_v40 = vadd.f32 %v3313_v49, %v745_v39 }
 0x909   :  { %v2646_v41 = vpop.f32.mrf.mxu1 }
 0x90a   :  { %2912 = vtanh.f32 %v746_v40  ;;  %v2388_v45 = vmul.f32 -1.442695, %v746_v40 }
 0x90b   :  { %2914 = vpow2.f32 %v2390_v44 }
 0x90c   :  { %2916 = vpow2.f32 %v2388_v45 }
 0x914   :  { %v2911_v42 = vpop.eup %2910 }
 0x915   :  { %877 = vrot.lane.b32.xlu0 %v2911_v42, %s3118_s22 }
 0x917   :  { %v2913_v43 = vpop.eup %2912 }
 0x918   :  { %v2915_v46 = vpop.eup %2914 }
 0x919   :  { %758 = vrot.lane.b32.xlu0 %v2913_v43, %s3118_s22  ;;  %v871_v47 = vadd.f32 1.0, %v2915_v46  ;;  %v2917_v48 = vpop.eup %2916 }
 0x91a   :  { %v752_v50 = vadd.f32 1.0, %v2917_v48 }
 0x91b   :  { %2918 = vrcp.f32 %v871_v47 }
 0x91c   :  { %2920 = vrcp.f32 %v752_v50 }
 0x928   :  { %v2919_v51 = vpop.eup %2918 }
 0x929   :  { %v2921_v54 = vpop.eup %2920  ;;  %v875_v57 = vmul.f32 %v2919_v51, %v3379_v0 }
 0x92a   :  { %v756_v60 = vmul.f32 %v2921_v54, %v3383_v9  ;;  %v1014_v9 = vsel %vm1013_vm8, %v3194_v6, 0.0 }
 0x92b   :  { %v1015_v16 = vsel %vm94_vm2, %v1014_v9, 0.0 }
 0x987   :  { %v878_v52 = vpop.permute.xlu0 %877 }
 0x988   :  { %v880_v53 = vmul.f32 %v2919_v51, %v878_v52 }
 0x98a   :  { %882 = vrot.lane.b32.xlu0 %v880_v53, %s3119_s23 }
 0x98b   :  { %v759_v55 = vpop.permute.xlu0 %758 }
 0x98c   :  { %v761_v56 = vmul.f32 %v2921_v54, %v759_v55 }
 0x98e   :  { %763 = vrot.lane.b32.xlu0 %v761_v56, %s3119_s23 }
 0x9fc   :  { %v883_v58 = vpop.permute.xlu0 %882 }
 0x9fd   :  { %v3437_v59 = vadd.f32 %v883_v58, %v875_v57 }
 0x9ff   :  { %2922 = vtanh.f32 %v3437_v59 }
 0xa00   :  { %v764_v61 = vpop.permute.xlu0 %763 }
 0xa01   :  { %v3441_v62 = vadd.f32 %v764_v61, %v756_v60 }
 0xa03   :  { %2924 = vtanh.f32 %v3441_v62 }
 0xa0c   :  { %v2923_v63 = vpop.eup %2922 }
 0xa0d   :  { %888 = vrot.lane.b32.xlu0 %v2923_v63, %s3118_s22 }
 0xa10   :  { %v2925_v1 = vpop.eup %2924 }
 0xa11   :  { %769 = vrot.lane.b32.xlu0 %v2925_v1, %s3118_s22 }
 0xa7f   :  { %v889_v8 = vpop.permute.xlu0 %888 }
 0xa80   :  { %v891_v0 = vmul.f32 %v2919_v51, %v889_v8 }
 0xa82   :  { %893 = vrot.lane.b32.xlu1 %v891_v0, %s3119_s23 }
 0xa83   :  { %v770_v12 = vpop.permute.xlu0 %769 }
 0xa84   :  { %v3447_v13 = vmul.f32 %v2921_v54, %v770_v12 }
 0xa86   :  { %897 = vrot.lane.b32.xlu0 %v3447_v13, %s3118_s22 }
 0xaa5   :  { %1016 = vadd.xlane.f32.xlu0 %v1015_v16 }
 0xaf4   :  { %v894_v15 = vpop.permute.xlu1 %893 }
 0xaf5   :  { %2686 = vmatmul.mubr.msk.f32.vlgmr.msra.gmra.mxu1 %vm105_vm4, %v894_v15 }
 0xaf6   :  { %2689 = vmatpush3.msra.mxu1 %v3239_v29  ;;  %2704 = vmatprep.mubr.msk.f32.mxu1 %vm3117_vm0, %v3116_v2 }
 0xaf7   :  { %2690 = vmatprep.subr.mxu1 %v3116_v2 }
 0xaf8   :  { %v898_v17 = vpop.permute.xlu0 %897  ;;  %2691 = vmatpush3.msra.mxu1 %v3241_v30 }
 0xaf9   :  { %v900_v18 = vsel %vm105_vm4, %v894_v15, %v898_v17  ;;  %2692 = vmatprep.subr.mxu1 %v3116_v2 }
 0xafa   :  { %2675 = vmatmul.mubr.msk.f32.vlgmr.msra.gmra.mxu0 %vm210_vm5, %v900_v18  ;;  %2693 = vmatpush3.msra.mxu1 %v3245_v31 }
 0xafb   :  { %2708 = vmatpush3.msra.mxu0 %v3186_v4  ;;  %2694 = vmatprep.subr.mxu1 %v3116_v2 }
 0xafc   :  { %2709 = vmatprep.subr.mxu0 %v3116_v2  ;;  %2695 = vmatpush3.msra.mxu1 %v3249_v32 }
 0xafd   :  { %2710 = vmatpush3.msra.mxu0 %v3188_v5  ;;  %2696 = vmatprep.subr.mxu1 %v3116_v2 }
 0xafe   :  { %2711 = vmatprep.subr.mxu0 %v3116_v2  ;;  %2697 = vmatpush3.msra.mxu1 %v3253_v33 }
 0xaff   :  { %2712 = vmatpush3.msra.mxu0 %v3198_v7  ;;  %2698 = vmatprep.subr.mxu1 %v3116_v2 }
 0xb00   :  { %2713 = vmatprep.subr.mxu0 %v3116_v2  ;;  %2715 = vmatprep.mubr.msk.f32.mxu0 %vm3117_vm0, %v3116_v2 }
 0xb01   :  { %2714 = vmatpush3.msra.mxu0 %v3208_v10  ;;  %2699 = vmatpush3.msra.mxu1 %v3257_v34 }
 0xb02   :  { %2700 = vmatprep.subr.mxu1 %v3116_v2  ;;  %2718 = vmatprep.subr.mxu0 %v3116_v2 }
 0xb03   :  { %2701 = vmatpush3.msra.mxu1 %v3261_v36 }
 0xb04   :  { %2702 = vmatprep.subr.mxu1 %v3116_v2 }
 0xb05   :  { %2703 = vmatpush3.msra.mxu1 %v3268_v37 }
 0xb06   :  { %2737 = vmatprep.subr.mxu1 %v3116_v2 }
 0xb2e   :  { %v1017_v20 = vpop.xlane.xlu0 %1016 }
 0xb2f   :  { %v1018_v21 = vmul.f32 %v3225_v11, %v1017_v20 }
 0xbb5   :  { %v1087_v22 = vpop.f32.mrf.mxu1 }
 0xbb6   :  { %v1091_v23 = vadd.f32 %v1087_v22, %v1018_v21 }
 0xbb7   :  { %v2687_v25 = vpop.f32.mrf.mxu1 }
 0xbb8   :  { %v1092_v26 = vadd.f32 %v3231_v14, %v1091_v23 }
 0xbba   :  { %2926 = vtanh.f32 %v1092_v26  ;;  %v970_v27 = vpop.f32.mrf.mxu0  ;;  %v2394_v40 = vmul.f32 -1.442695, %v1092_v26 }
 0xbbb   :  { %v971_v28 = vadd.f32 %v3313_v49, %v970_v27 }
 0xbbc   :  { %v2676_v35 = vpop.f32.mrf.mxu0 }
 0xbbd   :  { %2928 = vtanh.f32 %v971_v28  ;;  %v2392_v41 = vmul.f32 -1.442695, %v971_v28 }
 0xbbe   :  { %2930 = vpow2.f32 %v2394_v40 }
 0xbbf   :  { %2932 = vpow2.f32 %v2392_v41 }
 0xbc7   :  { %v2927_v38 = vpop.eup %2926 }
 0xbc8   :  { %1102 = vrot.lane.b32.xlu1 %v2927_v38, %s3118_s22 }
 0xbca   :  { %v2929_v39 = vpop.eup %2928 }
 0xbcb   :  { %v2931_v42 = vpop.eup %2930 }
 0xbcc   :  { %983 = vrot.lane.b32.xlu1 %v2929_v39, %s3118_s22  ;;  %v1096_v43 = vadd.f32 1.0, %v2931_v42  ;;  %v2933_v44 = vpop.eup %2932 }
 0xbcd   :  { %v977_v45 = vadd.f32 1.0, %v2933_v44 }
 0xbce   :  { %2934 = vrcp.f32 %v1096_v43 }
 0xbcf   :  { %2936 = vrcp.f32 %v977_v45 }
 0xbdb   :  { %v2935_v46 = vpop.eup %2934 }
 0xbdc   :  { %v2937_v50 = vpop.eup %2936  ;;  %v1100_v53 = vmul.f32 %v2935_v46, %v3437_v59 }
 0xbdd   :  { %v981_v56 = vmul.f32 %v2937_v50, %v3441_v62  ;;  %v1239_v62 = vsel %vm1238_vm9, %v3194_v6, 0.0 }
 0xbde   :  { %v1240_v0 = vsel %vm94_vm2, %v1239_v62, 0.0 }
 0xc3a   :  { %v1103_v47 = vpop.permute.xlu1 %1102 }
 0xc3b   :  { %v1105_v48 = vmul.f32 %v2935_v46, %v1103_v47 }
 0xc3d   :  { %1107 = vrot.lane.b32.xlu1 %v1105_v48, %s3119_s23 }
 0xc3e   :  { %v984_v51 = vpop.permute.xlu1 %983 }
 0xc3f   :  { %v986_v52 = vmul.f32 %v2937_v50, %v984_v51 }
 0xc41   :  { %988 = vrot.lane.b32.xlu1 %v986_v52, %s3119_s23 }
 0xcaf   :  { %v1108_v54 = vpop.permute.xlu1 %1107 }
 0xcb0   :  { %v3495_v55 = vadd.f32 %v1108_v54, %v1100_v53 }
 0xcb2   :  { %2938 = vtanh.f32 %v3495_v55 }
 0xcb3   :  { %v989_v57 = vpop.permute.xlu1 %988 }
 0xcb4   :  { %v3499_v58 = vadd.f32 %v989_v57, %v981_v56  ;;  %v1464_v56 = vsel %vm1463_vm10, %v3194_v6, 0.0  ;;  %v3582_v6 = vld [vmem:[#allocation3 + $0x18] sm:$0xff] }
 0xcb5   :  { %v1465_v57 = vsel %vm94_vm2, %v1464_v56, 0.0  ;;  %v3680_v56 = vld [vmem:[#allocation6 + $0x10] sm:$0xff] }
 0xcb6   :  { %2940 = vtanh.f32 %v3499_v58 }
 0xcbf   :  { %v2939_v60 = vpop.eup %2938 }
 0xcc0   :  { %1113 = vrot.lane.b32.xlu1 %v2939_v60, %s3118_s22 }
 0xcc3   :  { %v2941_v61 = vpop.eup %2940 }
 0xcc4   :  { %994 = vrot.lane.b32.xlu0 %v2941_v61, %s3118_s22 }
 0xd32   :  { %v1114_v63 = vpop.permute.xlu1 %1113 }
 0xd33   :  { %v1116_v59 = vmul.f32 %v2935_v46, %v1114_v63 }
 0xd35   :  { %1118 = vrot.lane.b32.xlu1 %v1116_v59, %s3119_s23 }
 0xd36   :  { %v995_v1 = vpop.permute.xlu0 %994 }
 0xd37   :  { %v3505_v8 = vmul.f32 %v2937_v50, %v995_v1 }
 0xd39   :  { %1122 = vrot.lane.b32.xlu1 %v3505_v8, %s3118_s22 }
 0xd5d   :  { %1241 = vadd.xlane.f32.xlu1 %v1240_v0 }
 0xda7   :  { %v1119_v12 = vpop.permute.xlu1 %1118 }
 0xda8   :  { %2716 = vmatmul.mubr.msk.f32.vlgmr.msra.gmra.mxu0 %vm105_vm4, %v1119_v12 }
 0xda9   :  { %2719 = vmatpush3.msra.mxu0 %v3239_v29  ;;  %2734 = vmatprep.mubr.msk.f32.mxu0 %vm3117_vm0, %v3116_v2 }
 0xdaa   :  { %2720 = vmatprep.subr.mxu0 %v3116_v2 }
 0xdab   :  { %v1123_v9 = vpop.permute.xlu1 %1122  ;;  %2721 = vmatpush3.msra.mxu0 %v3241_v30 }
 0xdac   :  { %v1125_v16 = vsel %vm105_vm4, %v1119_v12, %v1123_v9  ;;  %2722 = vmatprep.subr.mxu0 %v3116_v2 }
 0xdad   :  { %2705 = vmatmul.mubr.msk.f32.vlgmr.msra.gmra.mxu1 %vm210_vm5, %v1125_v16  ;;  %2723 = vmatpush3.msra.mxu0 %v3245_v31 }
 0xdae   :  { %2738 = vmatpush3.msra.mxu1 %v3186_v4  ;;  %2724 = vmatprep.subr.mxu0 %v3116_v2 }
 0xdaf   :  { %2739 = vmatprep.subr.mxu1 %v3116_v2  ;;  %2725 = vmatpush3.msra.mxu0 %v3249_v32 }
 0xdb0   :  { %2740 = vmatpush3.msra.mxu1 %v3188_v5  ;;  %2726 = vmatprep.subr.mxu0 %v3116_v2 }
 0xdb1   :  { %2741 = vmatprep.subr.mxu1 %v3116_v2  ;;  %2727 = vmatpush3.msra.mxu0 %v3253_v33 }
 0xdb2   :  { %2742 = vmatpush3.msra.mxu1 %v3198_v7  ;;  %2728 = vmatprep.subr.mxu0 %v3116_v2 }
 0xdb3   :  { %2743 = vmatprep.subr.mxu1 %v3116_v2  ;;  %2745 = vmatprep.mubr.msk.f32.mxu1 %vm3117_vm0, %v3116_v2 }
 0xdb4   :  { %2744 = vmatpush3.msra.mxu1 %v3208_v10  ;;  %2729 = vmatpush3.msra.mxu0 %v3257_v34 }
 0xdb5   :  { %2730 = vmatprep.subr.mxu0 %v3116_v2  ;;  %2748 = vmatprep.subr.mxu1 %v3116_v2 }
 0xdb6   :  { %2731 = vmatpush3.msra.mxu0 %v3261_v36 }
 0xdb7   :  { %2732 = vmatprep.subr.mxu0 %v3116_v2 }
 0xdb8   :  { %2733 = vmatpush3.msra.mxu0 %v3268_v37 }
 0xdb9   :  { %2767 = vmatprep.subr.mxu0 %v3116_v2 }
 0xde6   :  { %v1242_v4 = vpop.xlane.xlu1 %1241 }
 0xde7   :  { %v1243_v5 = vmul.f32 %v3225_v11, %v1242_v4 }
 0xe68   :  { %v1312_v7 = vpop.f32.mrf.mxu0 }
 0xe69   :  { %v1316_v15 = vadd.f32 %v1312_v7, %v1243_v5 }
 0xe6a   :  { %v2717_v10 = vpop.f32.mrf.mxu0 }
 0xe6b   :  { %v1317_v17 = vadd.f32 %v3231_v14, %v1316_v15 }
 0xe6d   :  { %2942 = vtanh.f32 %v1317_v17  ;;  %v1195_v18 = vpop.f32.mrf.mxu1  ;;  %v2398_v25 = vmul.f32 -1.442695, %v1317_v17 }
 0xe6e   :  { %v1196_v20 = vadd.f32 %v3313_v49, %v1195_v18 }
 0xe6f   :  { %v2706_v21 = vpop.f32.mrf.mxu1 }
 0xe70   :  { %2944 = vtanh.f32 %v1196_v20  ;;  %v2396_v11 = vmul.f32 -1.442695, %v1196_v20 }
 0xe71   :  { %2946 = vpow2.f32 %v2398_v25 }
 0xe72   :  { %2948 = vpow2.f32 %v2396_v11 }
 0xe7a   :  { %v2943_v22 = vpop.eup %2942 }
 0xe7b   :  { %1327 = vrot.lane.b32.xlu0 %v2943_v22, %s3118_s22 }
 0xe7d   :  { %v2945_v23 = vpop.eup %2944 }
 0xe7e   :  { %v2947_v26 = vpop.eup %2946 }
 0xe7f   :  { %1208 = vrot.lane.b32.xlu0 %v2945_v23, %s3118_s22  ;;  %v1321_v27 = vadd.f32 1.0, %v2947_v26  ;;  %v2949_v28 = vpop.eup %2948 }
 0xe80   :  { %v1202_v14 = vadd.f32 1.0, %v2949_v28 }
 0xe81   :  { %2950 = vrcp.f32 %v1321_v27 }
 0xe82   :  { %2952 = vrcp.f32 %v1202_v14 }
 0xe8e   :  { %v2951_v35 = vpop.eup %2950 }
 0xe8f   :  { %v2953_v40 = vpop.eup %2952  ;;  %v1325_v43 = vmul.f32 %v2951_v35, %v3495_v55 }
 0xe90   :  { %v1206_v46 = vmul.f32 %v2953_v40, %v3499_v58 }
 0xeed   :  { %v1328_v38 = vpop.permute.xlu0 %1327 }
 0xeee   :  { %v1330_v39 = vmul.f32 %v2951_v35, %v1328_v38 }
 0xef0   :  { %1332 = vrot.lane.b32.xlu0 %v1330_v39, %s3119_s23 }
 0xef1   :  { %v1209_v41 = vpop.permute.xlu0 %1208 }
 0xef2   :  { %v1211_v42 = vmul.f32 %v2953_v40, %v1209_v41 }
 0xef4   :  { %1213 = vrot.lane.b32.xlu0 %v1211_v42, %s3119_s23 }
 0xf62   :  { %v1333_v44 = vpop.permute.xlu0 %1332 }
 0xf63   :  { %v3553_v45 = vadd.f32 %v1333_v44, %v1325_v43  ;;  %v3036_v43 = vld [vmem:[%s3899_s0] sm:$0x3] }
 0xf64   :  { %v1689_v44 = vsel %vm1688_vm11, %v3036_v43, 0.0 }
 0xf65   :  { %2954 = vtanh.f32 %v3553_v45 }
 0xf66   :  { %v1214_v47 = vpop.permute.xlu0 %1213 }
 0xf67   :  { %v3557_v48 = vadd.f32 %v1214_v47, %v1206_v46  ;;  %v3651_v47 = vld [vmem:[#allocation6 + $0x38] sm:$0xff] }
 0xf69   :  { %2956 = vtanh.f32 %v3557_v48 }
 0xf72   :  { %v2955_v50 = vpop.eup %2954 }
 0xf73   :  { %1338 = vrot.lane.b32.xlu0 %v2955_v50, %s3118_s22  ;;  %v3657_v50 = vld [vmem:[#allocation6 + $0x30] sm:$0xff] }
 0xf76   :  { %v2957_v51 = vpop.eup %2956 }
 0xf77   :  { %1219 = vrot.lane.b32.xlu0 %v2957_v51, %s3118_s22 }
 0xfe5   :  { %v1339_v52 = vpop.permute.xlu0 %1338 }
 0xfe6   :  { %v1341_v53 = vmul.f32 %v2951_v35, %v1339_v52  ;;  %v3663_v52 = vld [vmem:[#allocation6 + $0x28] sm:$0xff] }
 0xfe8   :  { %1343 = vrot.lane.b32.xlu1 %v1341_v53, %s3119_s23  ;;  %v3668_v53 = vld [vmem:[#allocation6 + $0x20] sm:$0xff] }
 0xfe9   :  { %v1220_v54 = vpop.permute.xlu0 %1219 }
 0xfea   :  { %v3563_v55 = vmul.f32 %v2953_v40, %v1220_v54  ;;  %v3674_v54 = vld [vmem:[#allocation6 + $0x18] sm:$0xff] }
 0xfec   :  { %1347 = vrot.lane.b32.xlu0 %v3563_v55, %s3118_s22 }
0x100b   :  { %1466 = vadd.xlane.f32.xlu0 %v1465_v57  ;;  %v3686_v57 = vld [vmem:[#allocation6 + $0x8] sm:$0xff] }
0x105a   :  { %v1344_v58 = vpop.permute.xlu1 %1343 }
0x105b   :  { %2746 = vmatmul.mubr.msk.f32.vlgmr.msra.gmra.mxu1 %vm105_vm4, %v1344_v58 }
0x105c   :  { %2749 = vmatpush3.msra.mxu1 %v3239_v29  ;;  %2764 = vmatprep.mubr.msk.f32.mxu1 %vm3117_vm0, %v3116_v2  ;;  %v3588_v29 = vld [vmem:[#allocation3 + $0x10] sm:$0xff] }
0x105d   :  { %2750 = vmatprep.subr.mxu1 %v3116_v2 }
0x105e   :  { %v1348_v60 = vpop.permute.xlu0 %1347  ;;  %2751 = vmatpush3.msra.mxu1 %v3241_v30  ;;  %v3594_v30 = vld [vmem:[#allocation3 + $0x8] sm:$0xff] }
0x105f   :  { %v1350_v61 = vsel %vm105_vm4, %v1344_v58, %v1348_v60  ;;  %2752 = vmatprep.subr.mxu1 %v3116_v2  ;;  %v3693_v58 = vld [vmem:[#allocation6] sm:$0xff] }
0x1060   :  { %2735 = vmatmul.mubr.msk.f32.vlgmr.msra.gmra.mxu0 %vm210_vm5, %v1350_v61  ;;  %2753 = vmatpush3.msra.mxu1 %v3245_v31  ;;  %v3601_v31 = vld [vmem:[#allocation3] sm:$0xff] }
0x1061   :  { %2768 = vmatpush3.msra.mxu0 %v3582_v6  ;;  %2754 = vmatprep.subr.mxu1 %v3116_v2 }
0x1062   :  { %2769 = vmatprep.subr.mxu0 %v3116_v2  ;;  %2755 = vmatpush3.msra.mxu1 %v3249_v32 }
0x1063   :  { %2770 = vmatpush3.msra.mxu0 %v3588_v29  ;;  %2756 = vmatprep.subr.mxu1 %v3116_v2 }
0x1064   :  { %2771 = vmatprep.subr.mxu0 %v3116_v2  ;;  %2757 = vmatpush3.msra.mxu1 %v3253_v33  ;;  %v3614_v33 = vld [vmem:[%s3900_s1] ss:$0 sm:$0xff] }
0x1065   :  { %2772 = vmatpush3.msra.mxu0 %v3594_v30  ;;  %2758 = vmatprep.subr.mxu1 %v3116_v2 }
0x1066   :  { %2773 = vmatprep.subr.mxu0 %v3116_v2  ;;  %2775 = vmatprep.mubr.msk.f32.mxu0 %vm3117_vm0, %v3116_v2 }
0x1067   :  { %2774 = vmatpush3.msra.mxu0 %v3601_v31  ;;  %2759 = vmatpush3.msra.mxu1 %v3257_v34 }
0x1068   :  { %2760 = vmatprep.subr.mxu1 %v3116_v2  ;;  %2778 = vmatprep.subr.mxu0 %v3116_v2 }
0x1069   :  { %2761 = vmatpush3.msra.mxu1 %v3261_v36  ;;  %v3620_v36 = vld [vmem:[%s3902_s3] ss:$0 sm:$0xff] }
0x106a   :  { %2762 = vmatprep.subr.mxu1 %v3116_v2 }
0x106b   :  { %2763 = vmatpush3.msra.mxu1 %v3268_v37 }
0x106c   :  { %2797 = vmatprep.subr.mxu1 %v3116_v2 }
0x1094   :  { %v1467_v32 = vpop.xlane.xlu0 %1466 }
0x1095   :  { %v1468_v34 = vmul.f32 %v3614_v33, %v1467_v32 }
0x111b   :  { %v1537_v63 = vpop.f32.mrf.mxu1 }
0x111c   :  { %v1541_v59 = vadd.f32 %v1537_v63, %v1468_v34 }
0x111d   :  { %v2747_v1 = vpop.f32.mrf.mxu1 }
0x111e   :  { %v1542_v37 = vadd.f32 %v3620_v36, %v1541_v59  ;;  %v3701_v1 = vld [vmem:[%s3904_s5] ss:$0 sm:$0xff] }
0x1120   :  { %2958 = vtanh.f32 %v1542_v37  ;;  %v1420_v62 = vpop.f32.mrf.mxu0  ;;  %v2402_v4 = vmul.f32 -1.442695, %v1542_v37 }
0x1121   :  { %v1421_v0 = vadd.f32 %v3313_v49, %v1420_v62 }
0x1122   :  { %v2736_v12 = vpop.f32.mrf.mxu0 }
0x1123   :  { %2960 = vtanh.f32 %v1421_v0  ;;  %v2400_v5 = vmul.f32 -1.442695, %v1421_v0 }
0x1124   :  { %2962 = vpow2.f32 %v2402_v4 }
0x1125   :  { %2964 = vpow2.f32 %v2400_v5 }
0x112d   :  { %v2959_v9 = vpop.eup %2958 }
0x112e   :  { %1552 = vrot.lane.b32.xlu1 %v2959_v9, %s3118_s22 }
0x1130   :  { %v2961_v16 = vpop.eup %2960 }
0x1131   :  { %v2963_v7 = vpop.eup %2962 }
0x1132   :  { %1433 = vrot.lane.b32.xlu1 %v2961_v16, %s3118_s22  ;;  %v1546_v15 = vadd.f32 1.0, %v2963_v7  ;;  %v2965_v10 = vpop.eup %2964 }
0x1133   :  { %v1427_v17 = vadd.f32 1.0, %v2965_v10 }
0x1134   :  { %2966 = vrcp.f32 %v1546_v15 }
0x1135   :  { %2968 = vrcp.f32 %v1427_v17 }
0x1141   :  { %v2967_v18 = vpop.eup %2966 }
0x1142   :  { %v2969_v21 = vpop.eup %2968  ;;  %v1550_v25 = vmul.f32 %v2967_v18, %v3553_v45  ;;  %v1690_v45 = vsel %vm94_vm2, %v1689_v44, 0.0 }
0x1143   :  { %v1431_v27 = vmul.f32 %v2969_v21, %v3557_v48 }
0x11a0   :  { %v1553_v49 = vpop.permute.xlu1 %1552 }
0x11a1   :  { %v1555_v20 = vmul.f32 %v2967_v18, %v1553_v49 }
0x11a3   :  { %1557 = vrot.lane.b32.xlu1 %v1555_v20, %s3119_s23 }
0x11a4   :  { %v1434_v22 = vpop.permute.xlu1 %1433 }
0x11a5   :  { %v1436_v23 = vmul.f32 %v2969_v21, %v1434_v22 }
0x11a7   :  { %1438 = vrot.lane.b32.xlu1 %v1436_v23, %s3119_s23 }
0x1215   :  { %v1558_v11 = vpop.permute.xlu1 %1557 }
0x1216   :  { %v3629_v26 = vadd.f32 %v1558_v11, %v1550_v25 }
0x1218   :  { %2970 = vtanh.f32 %v3629_v26 }
0x1219   :  { %v1439_v28 = vpop.permute.xlu1 %1438 }
0x121a   :  { %v3633_v14 = vadd.f32 %v1439_v28, %v1431_v27 }
0x121c   :  { %2972 = vtanh.f32 %v3633_v14 }
0x1225   :  { %v2971_v35 = vpop.eup %2970 }
0x1226   :  { %1563 = vrot.lane.b32.xlu1 %v2971_v35, %s3118_s22 }
0x1229   :  { %v2973_v38 = vpop.eup %2972 }
0x122a   :  { %1444 = vrot.lane.b32.xlu0 %v2973_v38, %s3118_s22 }
0x1298   :  { %v1564_v39 = vpop.permute.xlu1 %1563 }
0x1299   :  { %v1566_v40 = vmul.f32 %v2967_v18, %v1564_v39 }
0x129b   :  { %1568 = vrot.lane.b32.xlu1 %v1566_v40, %s3119_s23 }
0x129c   :  { %v1445_v41 = vpop.permute.xlu0 %1444 }
0x129d   :  { %v3639_v42 = vmul.f32 %v2969_v21, %v1445_v41 }
0x129f   :  { %1572 = vrot.lane.b32.xlu1 %v3639_v42, %s3118_s22 }
0x12c3   :  { %1691 = vadd.xlane.f32.xlu1 %v1690_v45 }
0x130d   :  { %v1569_v46 = vpop.permute.xlu1 %1568 }
0x130e   :  { %2776 = vmatmul.mubr.msk.f32.vlgmr.msra.gmra.mxu0 %vm105_vm4, %v1569_v46 }
0x130f   :  { %2779 = vmatpush3.msra.mxu0 %v3651_v47  ;;  %2794 = vmatprep.mubr.msk.f32.mxu0 %vm3117_vm0, %v3116_v2 }
0x1310   :  { %2780 = vmatprep.subr.mxu0 %v3116_v2 }
0x1311   :  { %v1573_v48 = vpop.permute.xlu1 %1572  ;;  %2781 = vmatpush3.msra.mxu0 %v3657_v50 }
0x1312   :  { %v1575_v51 = vsel %vm105_vm4, %v1569_v46, %v1573_v48  ;;  %2782 = vmatprep.subr.mxu0 %v3116_v2 }
0x1313   :  { %2765 = vmatmul.mubr.msk.f32.vlgmr.msra.gmra.mxu1 %vm210_vm5, %v1575_v51  ;;  %2783 = vmatpush3.msra.mxu0 %v3663_v52 }
0x1314   :  { %2784 = vmatprep.subr.mxu0 %v3116_v2  ;;  %2798 = vmatpush3.msra.mxu1 %v3582_v6 }
0x1315   :  { %2785 = vmatpush3.msra.mxu0 %v3668_v53  ;;  %2799 = vmatprep.subr.mxu1 %v3116_v2 }
0x1316   :  { %2786 = vmatprep.subr.mxu0 %v3116_v2  ;;  %2800 = vmatpush3.msra.mxu1 %v3588_v29 }
0x1317   :  { %2787 = vmatpush3.msra.mxu0 %v3674_v54  ;;  %2801 = vmatprep.subr.mxu1 %v3116_v2 }
0x1318   :  { %2788 = vmatprep.subr.mxu0 %v3116_v2  ;;  %2802 = vmatpush3.msra.mxu1 %v3594_v30 }
0x1319   :  { %2789 = vmatpush3.msra.mxu0 %v3680_v56  ;;  %2803 = vmatprep.subr.mxu1 %v3116_v2 }
0x131a   :  { %2790 = vmatprep.subr.mxu0 %v3116_v2  ;;  %2804 = vmatpush3.msra.mxu1 %v3601_v31 }
0x131b   :  { %2791 = vmatpush3.msra.mxu0 %v3686_v57  ;;  %2805 = vmatprep.mubr.msk.f32.mxu1 %vm3117_vm0, %v3116_v2 }
0x131c   :  { %2792 = vmatprep.subr.mxu0 %v3116_v2  ;;  %2808 = vmatprep.subr.mxu1 %v3116_v2 }
0x131d   :  { %2793 = vmatpush3.msra.mxu0 %v3693_v58 }
0x131e   :  { %2827 = vmatprep.subr.mxu0 %v3116_v2 }
0x134c   :  { %v1692_v60 = vpop.xlane.xlu1 %1691 }
0x134d   :  { %v1693_v61 = vmul.f32 %v3614_v33, %v1692_v60 }
0x13ce   :  { %v1762_v32 = vpop.f32.mrf.mxu0 }
0x13cf   :  { %v1766_v63 = vadd.f32 %v1762_v32, %v1693_v61 }
0x13d0   :  { %v2777_v34 = vpop.f32.mrf.mxu0 }
0x13d1   :  { %v1767_v0 = vadd.f32 %v3620_v36, %v1766_v63 }
0x13d3   :  { %v1645_v59 = vpop.f32.mrf.mxu1  ;;  %v2406_v4 = vmul.f32 -1.442695, %v1767_v0 }
0x13d4   :  { %v1646_v37 = vadd.f32 %v3701_v1, %v1645_v59 }
0x13d5   :  { %v2766_v62 = vpop.f32.mrf.mxu1 }
0x13d6   :  { %2974 = vtanh.f32 %v1646_v37  ;;  %v2404_v16 = vmul.f32 -1.442695, %v1646_v37 }
0x13d7   :  { %2976 = vtanh.f32 %v1767_v0 }
0x13d8   :  { %2978 = vpow2.f32 %v2404_v16 }
0x13d9   :  { %2980 = vpow2.f32 %v2406_v4 }
0x13e3   :  { %v2975_v12 = vpop.eup %2974 }
0x13e4   :  { %1658 = vrot.lane.b32.xlu0 %v2975_v12, %s3118_s22  ;;  %v2977_v9 = vpop.eup %2976 }
0x13e5   :  { %v2979_v5 = vpop.eup %2978 }
0x13e6   :  { %v1652_v7 = vadd.f32 1.0, %v2979_v5  ;;  %v2981_v15 = vpop.eup %2980 }
0x13e7   :  { %v1771_v10 = vadd.f32 1.0, %v2981_v15 }
0x13e8   :  { %1777 = vrot.lane.b32.xlu0 %v2977_v9, %s3118_s22  ;;  %2982 = vrcp.f32 %v1652_v7 }
0x13e9   :  { %2984 = vrcp.f32 %v1771_v10  ;;  %v3121_v10 = vmov 0  }
0x13ea   :  { %2868 = vset.pattern.permute.xlu0 %v3121_v10  ;;  %2869 = vset.pattern.permute.xlu1 %v3121_v10 }
0x13f5   :  { %v2983_v17 = vpop.eup %2982 }
0x13f6   :  { %v2985_v20 = vpop.eup %2984  ;;  %v1656_v23 = vmul.f32 %v2983_v17, %v3633_v14 }
0x13f7   :  { %v1775_v27 = vmul.f32 %v2985_v20, %v3629_v26  ;;  %v2379_v26 = vld [vmem:[%s3905_s6] ss:$0 sm:$0xff]  ;;  %s3122_s6 = smov [#allocation8]  }
0x13f8   :  { %s2363_s11 = sshll.u32 %s3122_s6, 4  ;;  %s2364_s11 = int_to_ptr.vmem [resolvable:$true] %s2363_s11 }
0x13f9   :  { %s3086_s12 = scalar_lea.vmem %s2364_s11, 32  ;;  %p3091_p11 = scmp.lt.s32.totalorder %s2364_s11, %s2364_s11 }
0x13fa   :  { %p3087_p10 = scmp.ne.s32.totalorder %s2364_s11, %s3086_s12  ;;  %p3092_p12 = scmp.lt.s32.totalorder %s3086_s12, %s3086_s12 }
0x13fc   :  { %p3093_p13 = por %p3092_p12, %p3091_p11 }
0x13fe   :  { %p3094_p0 = pnand %p3093_p13, %p3087_p10 }
0x1456   :  { %v1659_v18 = vpop.permute.xlu0 %1658 }
0x1457   :  { %v1661_v49 = vmul.f32 %v2983_v17, %v1659_v18 }
0x1459   :  { %1663 = vrot.lane.b32.xlu0 %v1661_v49, %s3119_s23 }
0x145a   :  { %v1778_v21 = vpop.permute.xlu0 %1777 }
0x145b   :  { %v1780_v22 = vmul.f32 %v2985_v20, %v1778_v21 }
0x145d   :  { %1782 = vrot.lane.b32.xlu0 %v1780_v22, %s3119_s23 }
0x14cb   :  { %v1664_v25 = vpop.permute.xlu0 %1663 }
0x14cc   :  { %v3710_v11 = vadd.f32 %v1664_v25, %v1656_v23 }
0x14ce   :  { %2986 = vtanh.f32 %v3710_v11 }
0x14cf   :  { %v1783_v28 = vpop.permute.xlu0 %1782 }
0x14d0   :  { %v3714_v35 = vadd.f32 %v1783_v28, %v1775_v27 }
0x14d2   :  { %2988 = vtanh.f32 %v3714_v35 }
0x14db   :  { %v2987_v38 = vpop.eup %2986 }
0x14dc   :  { %1669 = vrot.lane.b32.xlu0 %v2987_v38, %s3118_s22 }
0x14df   :  { %v2989_v39 = vpop.eup %2988 }
0x14e0   :  { %1788 = vrot.lane.b32.xlu0 %v2989_v39, %s3118_s22 }
0x154e   :  { %v1670_v40 = vpop.permute.xlu0 %1669 }
0x154f   :  { %v3719_v14 = vmul.f32 %v2983_v17, %v1670_v40  ;;  %v3770_v17 = vld [vmem:[#allocation2] ss:$0 sm:$0xff] }
0x1551   :  { %1797 = vrot.lane.b32.xlu0 %v3719_v14, %s3118_s22 }
0x1552   :  { %v1789_v41 = vpop.permute.xlu0 %1788 }
0x1553   :  { %v1791_v43 = vmul.f32 %v2985_v20, %v1789_v41 }
0x1555   :  { %1793 = vrot.lane.b32.xlu1 %v1791_v43, %s3119_s23 }
0x1559   :  { %313 = vrot.lane.b32.xlu1 %v2379_v26, %s3120_s10 }
0x15c3   :  { %v1798_v44 = vpop.permute.xlu0 %1797 }
0x15c7   :  { %v1794_v45 = vpop.permute.xlu1 %1793 }
0x15c8   :  { %v1800_v46 = vsel %vm105_vm4, %v1794_v45, %v1798_v44  ;;  %2806 = vmatmul.mubr.msk.f32.vlgmr.msra.gmra.mxu1 %vm105_vm4, %v1794_v45 }
0x15c9   :  { %2795 = vmatmul.mubr.msk.f32.vlgmr.msra.gmra.mxu0 %vm210_vm5, %v1800_v46  ;;  %2809 = vmatpush3.msra.mxu1 %v3651_v47 }
0x15ca   :  { %2810 = vmatprep.subr.mxu1 %v3116_v2  ;;  %2828 = vmatpush3.msra.mxu0 %v3582_v6 }
0x15cb   :  { %2811 = vmatpush3.msra.mxu1 %v3657_v50  ;;  %2829 = vmatprep.subr.mxu0 %v3116_v2  ;;  %v3765_v4 = vpop.permute.xlu1 %313 }
0x15cc   :  { %2812 = vmatprep.subr.mxu1 %v3116_v2  ;;  %2830 = vmatpush3.msra.mxu0 %v3588_v29 }
0x15cd   :  { %2813 = vmatpush3.msra.mxu1 %v3663_v52  ;;  %2831 = vmatprep.subr.mxu0 %v3116_v2 }
0x15ce   :  { %2814 = vmatprep.subr.mxu1 %v3116_v2  ;;  %2832 = vmatpush3.msra.mxu0 %v3594_v30 }
0x15cf   :  { %2815 = vmatpush3.msra.mxu1 %v3668_v53  ;;  %2833 = vmatprep.subr.mxu0 %v3116_v2 }
0x15d0   :  { %2816 = vmatprep.subr.mxu1 %v3116_v2  ;;  %2834 = vmatpush3.msra.mxu0 %v3601_v31 }
0x15d1   :  { %2817 = vmatpush3.msra.mxu1 %v3674_v54  ;;  %2835 = vmatprep.mubr.msk.f32.mxu0 %vm3117_vm0, %v3116_v2 }
0x15d2   :  { %2818 = vmatprep.subr.mxu1 %v3116_v2  ;;  %2824 = vmatprep.mubr.msk.f32.mxu1 %vm3117_vm0, %v3116_v2 }
0x15d3   :  { %2819 = vmatpush3.msra.mxu1 %v3680_v56  ;;  %2838 = vmatprep.subr.mxu0 %v3116_v2 }
0x15d4   :  { %2820 = vmatprep.subr.mxu1 %v3116_v2 }
0x15d5   :  { %2821 = vmatpush3.msra.mxu1 %v3686_v57 }
0x15d6   :  { %2822 = vmatprep.subr.mxu1 %v3116_v2 }
0x15d7   :  { %2823 = vmatpush3.msra.mxu1 %v3693_v58 }
0x1688   :  { %v1982_v6 = vpop.f32.mrf.mxu1 }
0x1689   :  { %v1870_v29 = vpop.f32.mrf.mxu0 }
0x168a   :  { %v1871_v30 = vadd.f32 %v3701_v1, %v1870_v29  ;;  %v2807_v31 = vpop.f32.mrf.mxu1 }
0x168b   :  { %v2796_v48 = vpop.f32.mrf.mxu0 }
0x168c   :  { %2990 = vtanh.f32 %v1871_v30  ;;  %v2408_v60 = vmul.f32 -1.442695, %v1871_v30 }
0x168e   :  { %2992 = vpow2.f32 %v2408_v60 }
0x1699   :  { %v2991_v51 = vpop.eup %2990 }
0x169a   :  { %1883 = vrot.lane.b32.xlu0 %v2991_v51, %s3118_s22 }
0x169b   :  { %v2993_v61 = vpop.eup %2992 }
0x169c   :  { %v1877_v32 = vadd.f32 1.0, %v2993_v61 }
0x169e   :  { %2994 = vrcp.f32 %v1877_v32 }
0x16ab   :  { %v2995_v34 = vpop.eup %2994 }
0x16ac   :  { %v1881_v37 = vmul.f32 %v2995_v34, %v3710_v11 }
0x170c   :  { %v1884_v63 = vpop.permute.xlu0 %1883 }
0x170d   :  { %v1886_v59 = vmul.f32 %v2995_v34, %v1884_v63 }
0x170f   :  { %1888 = vrot.lane.b32.xlu0 %v1886_v59, %s3119_s23 }
0x1781   :  { %v1889_v62 = vpop.permute.xlu0 %1888 }
0x1782   :  { %v3761_v0 = vadd.f32 %v1889_v62, %v1881_v37 }
0x1784   :  { %2996 = vtanh.f32 %v3761_v0 }
0x1791   :  { %v2997_v12 = vpop.eup %2996 }
0x1792   :  { %1894 = vrot.lane.b32.xlu0 %v2997_v12, %s3118_s22 }
0x1804   :  { %v1895_v9 = vpop.permute.xlu0 %1894 }
0x1805   :  { %v1897_v16 = vmul.f32 %v2995_v34, %v1895_v9 }
0x1807   :  { %v1898_v5 = vmul.f32 %v1897_v16, %v3765_v4 }
0x1809   :  { %1900 = vrot.lane.b32.xlu0 %v1898_v5, %s3119_s23 }
0x187b   :  { %v1901_v7 = vpop.permute.xlu0 %1900 }
0x187c   :  { %v1903_v15 = vsel %vm321_vm12, %v1901_v7, 0.0 }
0x187d   :  { %1904 = vadd.xlane.f32.xlu1 %v1903_v15 }
0x1906   :  { %v1905_v18 = vpop.xlane.xlu1 %1904 }
0x1907   :  { %v1906_v49 = vadd.f32 %v3770_v17, %v1905_v18 }
0x1909   :  { %1909 = vperm.xlu0 %2868, %v1906_v49  }
0x1984   :  { %v3773_v20 = vpop.permute.xlu0 %1909 }
0x1985   :  { %v1913_v21 = vmul.f32 %v3614_v33, %v3773_v20 }
0x1987   :  { %v1986_v22 = vadd.f32 %v1982_v6, %v1913_v21 }
0x1989   :  { %v1987_v23 = vadd.f32 %v3620_v36, %v1986_v22 }
0x198b   :  { %2998 = vtanh.f32 %v1987_v23  ;;  %v2410_v11 = vmul.f32 -1.442695, %v1987_v23 }
0x198d   :  { %3000 = vpow2.f32 %v2410_v11 }
0x1998   :  { %v2999_v25 = vpop.eup %2998 }
0x1999   :  { %1997 = vrot.lane.b32.xlu0 %v2999_v25, %s3118_s22 }
0x199a   :  { %v3001_v27 = vpop.eup %3000 }
0x199b   :  { %v1991_v28 = vadd.f32 1.0, %v3001_v27 }
0x199d   :  { %3002 = vrcp.f32 %v1991_v28 }
0x19aa   :  { %v3003_v38 = vpop.eup %3002 }
0x19ab   :  { %v1995_v41 = vmul.f32 %v3003_v38, %v3714_v35 }
0x1a0b   :  { %v1998_v39 = vpop.permute.xlu0 %1997 }
0x1a0c   :  { %v2000_v40 = vmul.f32 %v3003_v38, %v1998_v39 }
0x1a0e   :  { %2002 = vrot.lane.b32.xlu0 %v2000_v40, %s3119_s23 }
0x1a80   :  { %v2003_v43 = vpop.permute.xlu0 %2002 }
0x1a81   :  { %v3781_v26 = vadd.f32 %v2003_v43, %v1995_v41 }
0x1a83   :  { %3004 = vtanh.f32 %v3781_v26 }
0x1a90   :  { %v3005_v44 = vpop.eup %3004 }
0x1a91   :  { %2008 = vrot.lane.b32.xlu0 %v3005_v44, %s3118_s22 }
0x1b03   :  { %v2009_v45 = vpop.permute.xlu0 %2008 }
0x1b04   :  { %v2011_v46 = vmul.f32 %v3003_v38, %v2009_v45 }
0x1b06   :  { %2013 = vrot.lane.b32.xlu0 %v2011_v46, %s3119_s23 }
0x1b0a   :  { %2017 = vrot.lane.b32.xlu0 %v1897_v16, %s3118_s22 }
0x1b78   :  { %v2014_v6 = vpop.permute.xlu0 %2013 }
0x1b79   :  { %2836 = vmatmul.mubr.msk.f32.vlgmr.msra.gmra.mxu0 %vm105_vm4, %v2014_v6 }
0x1b7a   :  { %2839 = vmatpush3.msra.mxu0 %v3651_v47  ;;  %2854 = vmatprep.mubr.msk.f32.mxu0 %vm3117_vm0, %v3116_v2 }
0x1b7b   :  { %2840 = vmatprep.subr.mxu0 %v3116_v2 }
0x1b7c   :  { %v2018_v35 = vpop.permute.xlu0 %2017  ;;  %2841 = vmatpush3.msra.mxu0 %v3657_v50 }
0x1b7d   :  { %v2020_v29 = vsel %vm105_vm4, %v2014_v6, %v2018_v35  ;;  %2842 = vmatprep.subr.mxu0 %v3116_v2 }
0x1b7e   :  { %2825 = vmatmul.mubr.msk.f32.vlgmr.msra.gmra.mxu1 %vm210_vm5, %v2020_v29  ;;  %2843 = vmatpush3.msra.mxu0 %v3663_v52 }
0x1b7f   :  { %2844 = vmatprep.subr.mxu0 %v3116_v2 }
0x1b80   :  { %2845 = vmatpush3.msra.mxu0 %v3668_v53 }
0x1b81   :  { %2846 = vmatprep.subr.mxu0 %v3116_v2 }
0x1b82   :  { %2847 = vmatpush3.msra.mxu0 %v3674_v54 }
0x1b83   :  { %2848 = vmatprep.subr.mxu0 %v3116_v2 }
0x1b84   :  { %2849 = vmatpush3.msra.mxu0 %v3680_v56 }
0x1b85   :  { %2850 = vmatprep.subr.mxu0 %v3116_v2 }
0x1b86   :  { %2851 = vmatpush3.msra.mxu0 %v3686_v57 }
0x1b87   :  { %2852 = vmatprep.subr.mxu0 %v3116_v2 }
0x1b88   :  { %2853 = vmatpush3.msra.mxu0 %v3693_v58 }
0x1c39   :  { %v2203_v47 = vpop.f32.mrf.mxu0 }
0x1c3b   :  { %v2837_v50 = vpop.f32.mrf.mxu0 }
0x1c3e   :  { %v2090_v52 = vpop.f32.mrf.mxu1 }
0x1c3f   :  { %v2091_v53 = vadd.f32 %v3701_v1, %v2090_v52 }
0x1c40   :  { %v2826_v30 = vpop.f32.mrf.mxu1 }
0x1c41   :  { %3006 = vtanh.f32 %v2091_v53  ;;  %v2412_v31 = vmul.f32 -1.442695, %v2091_v53  ;;  %v316_v53 = vmul.f32 %v3765_v4, %v3331_v24  ;;  %v773_v24 = vmul.f32 %v3447_v13, %v3765_v4 }
0x1c43   :  { %3008 = vpow2.f32 %v2412_v31 }
0x1c4e   :  { %v3007_v54 = vpop.eup %3006 }
0x1c4f   :  { %2103 = vrot.lane.b32.xlu0 %v3007_v54, %s3118_s22 }
0x1c50   :  { %v3009_v56 = vpop.eup %3008 }
0x1c51   :  { %v2097_v48 = vadd.f32 1.0, %v3009_v56 }
0x1c53   :  { %3010 = vrcp.f32 %v2097_v48 }
0x1c60   :  { %v3011_v57 = vpop.eup %3010 }
0x1c61   :  { %v2101_v58 = vmul.f32 %v3011_v57, %v3761_v0  ;;  %v548_v0 = vmul.f32 %v3389_v19, %v3765_v4 }
0x1cc1   :  { %v2104_v51 = vpop.permute.xlu0 %2103 }
0x1cc2   :  { %v2106_v2 = vmul.f32 %v3011_v57, %v2104_v51  ;;  %v1223_v51 = vmul.f32 %v3563_v55, %v3765_v4 }
0x1cc4   :  { %2108 = vrot.lane.b32.xlu0 %v2106_v2, %s3119_s23  ;;  %v1448_v2 = vmul.f32 %v3639_v42, %v3765_v4 }
0x1d36   :  { %v2109_v60 = vpop.permute.xlu0 %2108 }
0x1d37   :  { %v3811_v61 = vadd.f32 %v2109_v60, %v2101_v58 }
0x1d39   :  { %3012 = vtanh.f32 %v3811_v61 }
0x1d46   :  { %v3013_v32 = vpop.eup %3012 }
0x1d47   :  { %2114 = vrot.lane.b32.xlu1 %v3013_v32, %s3118_s22 }
0x1db9   :  { %v2115_v34 = vpop.permute.xlu1 %2114 }
0x1dba   :  { %v2117_v63 = vmul.f32 %v3011_v57, %v2115_v34  ;;  %v998_v57 = vmul.f32 %v3505_v8, %v3765_v4  ;;  %v1673_v8 = vmul.f32 %v3719_v14, %v3765_v4 }
0x1dbc   :  { %v2118_v59 = vmul.f32 %v2117_v63, %v3765_v4 }
0x1dbe   :  { %2120 = vrot.lane.b32.xlu0 %v2118_v59, %s3119_s23 }
0x1e30   :  { %v2121_v37 = vpop.permute.xlu0 %2120 }
0x1e31   :  { %v2123_v62 = vsel %vm321_vm12, %v2121_v37, 0.0 }
0x1e32   :  { %2124 = vadd.xlane.f32.xlu0 %v2123_v62 }
0x1e48   :  { %2238 = vrot.lane.b32.xlu0 %v2117_v63, %s3118_s22 }
0x1e4c   :  { %550 = vrot.lane.b32.xlu0 %v548_v0, %s3119_s23 }
0x1ebb   :  { %v2125_v12 = vpop.xlane.xlu0 %2124 }
0x1ebc   :  { %v2126_v9 = vadd.f32 %v3770_v17, %v2125_v12 }
0x1ebe   :  { %2130 = vperm.xlu1 %2869, %v2126_v9  }
0x1ebf   :  { %v2239_v16 = vpop.permute.xlu0 %2238 }
0x1ec3   :  { %v551_v5 = vpop.permute.xlu0 %550 }
0x1ec4   :  { %v553_v7 = vsel %vm321_vm12, %v551_v5, 0.0 }
0x1ec5   :  { %554 = vadd.xlane.f32.xlu0 %v553_v7 }
0x1f39   :  { %v3824_v15 = vpop.permute.xlu1 %2130 }
0x1f3a   :  { %v2134_v10 = vmul.f32 %v3614_v33, %v3824_v15 }
0x1f3c   :  { %v2207_v18 = vadd.f32 %v2203_v47, %v2134_v10 }
0x1f3e   :  { %v2208_v49 = vadd.f32 %v3620_v36, %v2207_v18 }
0x1f40   :  { %3014 = vtanh.f32 %v2208_v49  ;;  %v2414_v21 = vmul.f32 -1.442695, %v2208_v49 }
0x1f42   :  { %3016 = vpow2.f32 %v2414_v21 }
0x1f4d   :  { %v3015_v19 = vpop.eup %3014 }
0x1f4e   :  { %2218 = vrot.lane.b32.xlu1 %v3015_v19, %s3118_s22  ;;  %v555_v58 = vpop.xlane.xlu0 %554 }
0x1f4f   :  { %v3017_v22 = vpop.eup %3016  ;;  %v556_v5 = vadd.f32 %v3770_v17, %v555_v58 }
0x1f50   :  { %v2212_v23 = vadd.f32 1.0, %v3017_v22 }
0x1f52   :  { %3018 = vrcp.f32 %v2212_v23 }
0x1f5f   :  { %v3019_v25 = vpop.eup %3018 }
0x1f60   :  { %v2216_v28 = vmul.f32 %v3019_v25, %v3781_v26 }
0x1fc0   :  { %v2219_v11 = vpop.permute.xlu1 %2218 }
0x1fc1   :  { %v2221_v27 = vmul.f32 %v3019_v25, %v2219_v11 }
0x1fc3   :  { %2223 = vrot.lane.b32.xlu1 %v2221_v27, %s3119_s23 }
0x2035   :  { %v2224_v33 = vpop.permute.xlu1 %2223 }
0x2036   :  { %v2226_v38 = vadd.f32 %v2224_v33, %v2216_v28 }
0x2038   :  { %3020 = vtanh.f32 %v2226_v38 }
0x2045   :  { %v3021_v36 = vpop.eup %3020 }
0x2046   :  { %2229 = vrot.lane.b32.xlu1 %v3021_v36, %s3118_s22 }
0x20b8   :  { %v2230_v39 = vpop.permute.xlu1 %2229 }
0x20b9   :  { %v2232_v40 = vmul.f32 %v3019_v25, %v2230_v39 }
0x20bb   :  { %2234 = vrot.lane.b32.xlu1 %v2232_v40, %s3119_s23 }
0x212d   :  { %v2235_v41 = vpop.permute.xlu1 %2234 }
0x212e   :  { %v2241_v43 = vsel %vm105_vm4, %v2235_v41, %v2239_v16 }
0x212f   :  { %2855 = vmatmul.mubr.msk.f32.vlgmr.msra.gmra.mxu0 %vm210_vm5, %v2241_v43 }
0x21ef   :  { %v2311_v44 = vpop.f32.mrf.mxu0 }
0x21f0   :  { %v2312_v45 = vadd.f32 %v3701_v1, %v2311_v44 }
0x21f1   :  { %v2856_v46 = vpop.f32.mrf.mxu0 }
0x21f2   :  { %3022 = vtanh.f32 %v2312_v45  ;;  %v2416_v6 = vmul.f32 -1.442695, %v2312_v45 }
0x21f4   :  { %3024 = vpow2.f32 %v2416_v6 }
0x21ff   :  { %v3023_v26 = vpop.eup %3022 }
0x2200   :  { %2324 = vrot.lane.b32.xlu1 %v3023_v26, %s3118_s22 }
0x2201   :  { %v3025_v35 = vpop.eup %3024 }
0x2202   :  { %v2318_v29 = vadd.f32 1.0, %v3025_v35 }
0x2204   :  { %3026 = vrcp.f32 %v2318_v29 }
0x2211   :  { %v3027_v47 = vpop.eup %3026 }
0x2212   :  { %v2322_v1 = vmul.f32 %v3027_v47, %v3811_v61 }
0x2272   :  { %v2325_v50 = vpop.permute.xlu1 %2324 }
0x2273   :  { %v2327_v52 = vmul.f32 %v3027_v47, %v2325_v50 }
0x2275   :  { %2329 = vrot.lane.b32.xlu1 %v2327_v52, %s3119_s23 }
0x2279   :  { %318 = vrot.lane.b32.xlu1 %v316_v53, %s3119_s23 }
0x22e7   :  { %v2330_v30 = vpop.permute.xlu1 %2329 }
0x22e8   :  { %v2332_v54 = vadd.f32 %v2330_v30, %v2322_v1 }
0x22ea   :  { %3028 = vtanh.f32 %v2332_v54 }
0x22eb   :  { %v319_v31 = vpop.permute.xlu1 %318 }
0x22ec   :  { %v322_v56 = vsel %vm321_vm12, %v319_v31, 0.0 }
0x22ed   :  { %323 = vadd.xlane.f32.xlu1 %v322_v56 }
0x22f7   :  { %v3029_v48 = vpop.eup %3028 }
0x22f8   :  { %2335 = vrot.lane.b32.xlu0 %v3029_v48, %s3118_s22 }
0x22fc   :  { %1000 = vrot.lane.b32.xlu0 %v998_v57, %s3119_s23 }
0x22fe   :  { %775 = vrot.lane.b32.xlu1 %v773_v24, %s3119_s23 }
0x2300   :  { %1225 = vrot.lane.b32.xlu0 %v1223_v51, %s3119_s23 }
0x2304   :  { %1450 = vrot.lane.b32.xlu0 %v1448_v2, %s3119_s23 }
0x2308   :  { %1675 = vrot.lane.b32.xlu0 %v1673_v8, %s3119_s23 }
0x236a   :  { %v2336_v60 = vpop.permute.xlu0 %2335 }
0x236b   :  { %v2338_v13 = vmul.f32 %v3027_v47, %v2336_v60 }
0x236d   :  { %v2339_v61 = vmul.f32 %v2338_v13, %v3765_v4 }
0x236e   :  { %v1001_v55 = vpop.permute.xlu0 %1000 }
0x236f   :  { %2341 = vrot.lane.b32.xlu0 %v2339_v61, %s3119_s23  ;;  %v1003_v37 = vsel %vm321_vm12, %v1001_v55, 0.0 }
0x2372   :  { %v1226_v34 = vpop.permute.xlu0 %1225 }
0x2373   :  { %v1228_v14 = vsel %vm321_vm12, %v1226_v34, 0.0 }
0x2376   :  { %v324_v32 = vpop.xlane.xlu1 %323  ;;  %v1451_v59 = vpop.permute.xlu0 %1450 }
0x2377   :  { %v1453_v4 = vsel %vm321_vm12, %v1451_v59, 0.0  ;;  %v331_v12 = vadd.f32 %v3770_v17, %v324_v32 }
0x237a   :  { %v776_v63 = vpop.permute.xlu1 %775  ;;  %v1676_v62 = vpop.permute.xlu0 %1675 }
0x237b   :  { %v778_v42 = vsel %vm321_vm12, %v776_v63, 0.0  ;;  %v1678_v0 = vsel %vm321_vm12, %v1676_v62, 0.0 }
0x237c   :  { %779 = vadd.xlane.f32.xlu1 %v778_v42 }
0x2380   :  { %1004 = vadd.xlane.f32.xlu1 %v1003_v37 }
0x2384   :  { %1229 = vadd.xlane.f32.xlu1 %v1228_v14 }
0x2388   :  { %1679 = vadd.xlane.f32.xlu1 %v1678_v0 }
0x238e   :  { %1454 = vadd.xlane.f32.xlu0 %v1453_v4 }
0x23a4   :  { %334 = vperm.xlu0 %2868, %v331_v12  }
0x23e1   :  { %v2342_v9 = vpop.permute.xlu0 %2341 }
0x23e2   :  { %v2344_v16 = vsel %vm321_vm12, %v2342_v9, 0.0 }
0x23e3   :  { %2345 = vadd.xlane.f32.xlu1 %v2344_v16 }
0x23f4   :  { %559 = vperm.xlu1 %2869, %v556_v5  }
0x2405   :  { %v780_v7 = vpop.xlane.xlu1 %779 }
0x2406   :  { %v781_v10 = vadd.f32 %v3770_v17, %v780_v7 }
0x2408   :  { %784 = vperm.xlu0 %2868, %v781_v10  }
0x2409   :  { %v1005_v18 = vpop.xlane.xlu1 %1004 }
0x240a   :  { %v1006_v49 = vadd.f32 %v3770_v17, %v1005_v18 }
0x240c   :  { %1009 = vperm.xlu0 %2868, %v1006_v49  }
0x240d   :  { %v1230_v19 = vpop.xlane.xlu1 %1229 }
0x240e   :  { %v1231_v21 = vadd.f32 %v3770_v17, %v1230_v19 }
0x2410   :  { %1234 = vperm.xlu1 %2869, %v1231_v21  }
0x2411   :  { %v1680_v22 = vpop.xlane.xlu1 %1679 }
0x2412   :  { %v1681_v23 = vadd.f32 %v3770_v17, %v1680_v22 }
0x2414   :  { %1684 = vperm.xlu0 %2868, %v1681_v23  }
0x2417   :  { %v1455_v25 = vpop.xlane.xlu0 %1454 }
0x2418   :  { %v1456_v11 = vadd.f32 %v3770_v17, %v1455_v25 }
0x241a   :  { %1459 = vperm.xlu1 %2869, %v1456_v11  }
0x241f   :  { %v335_v33 = vpop.permute.xlu0 %334 }
0x2420   :  { %v337_v40 = vsel %vm92_vm1, %v335_v33, 0.0 }
0x246c   :  { %v2346_v27 = vpop.xlane.xlu1 %2345 }
0x246d   :  { %v2347_v28 = vadd.f32 %v3770_v17, %v2346_v27 }
0x246f   :  { %2351 = vperm.xlu1 %2869, %v2347_v28  }
0x2470   :  { %v560_v38 = vpop.permute.xlu1 %559 }
0x2471   :  { %v562_v43 = vsel %vm338_vm3, %v560_v38, %v337_v40 }
0x2483   :  { %v785_v36 = vpop.permute.xlu0 %784 }
0x2484   :  { %v787_v44 = vsel %vm563_vm6, %v785_v36, %v562_v43 }
0x2487   :  { %v1010_v41 = vpop.permute.xlu0 %1009 }
0x2488   :  { %v1012_v46 = vsel %vm788_vm7, %v1010_v41, %v787_v44 }
0x248b   :  { %v1235_v39 = vpop.permute.xlu1 %1234 }
0x248c   :  { %v1237_v17 = vsel %vm1013_vm8, %v1235_v39, %v1012_v46 }
0x248f   :  { %v1685_v6 = vpop.permute.xlu0 %1684 }
0x2495   :  { %v1460_v45 = vpop.permute.xlu1 %1459 }
0x2496   :  { %v1462_v26 = vsel %vm1238_vm9, %v1460_v45, %v1237_v17 }
0x2497   :  { %v1687_v35 = vsel %vm1463_vm10, %v1685_v6, %v1462_v26 }
0x2498   :  { %v1912_v29 = vsel %vm1688_vm11, %v3773_v20, %v1687_v35 }
0x2499   :  { %v2133_v50 = vsel %vm2127_vm13, %v3824_v15, %v1912_v29 }
0x24ea   :  { %v2352_v47 = vpop.permute.xlu1 %2351 }
0x24eb   :  { %v2354_v52 = vsel %vm2348_vm14, %v2352_v47, %v2133_v50 }
0x24ec   :  { %2356 = vst.msk [vmem:[#allocation8] sm:$0x3] %vm2355_vm15, %v2354_v52 }
0x24ed   :  { %3097 = shalt.err (!%p3094_p0)
}
0x24ee   :  { %2366 = dma.vmem_to_hbm [thread:$0]  %s2364_s11, 32, %s3907_s8, [#allocation5]  }
0x24ef   :  { %3110 = dma.done.wait [#allocation5], 32  }
0x24f0   :  { %3111 = vsyncadd [#allocation5], 4294967264 }
0x24f1   :  { %2370 = vsyncpa [#allocation4], 1 }
0x24f2   :  { %2371 = vsyncpa [#allocation7], 1 }
0x24f3   :  { %2372 = vsyncpa [#allocation5], 1 }

</bundles_post_ra>
